<compile_context>
chip_gen: v7x
topology: tpu7x:2x2x1
jax: 0.10.0
libtpu: 0.0.40
codegen_flags: <defaults>
</compile_context>

<pallas_src>
import functools
import math

import jax
import jax.numpy as jnp
from jax.experimental import pallas as pl
from jax.experimental.pallas import tpu as pltpu

_LN2D_EPS = 1e-6   # timm LayerNorm2d convention.  TODO(synk): confirm eps vs the (unshown) LayerNorm2d class.
_LN_EPS = 1e-5     # nn.LayerNorm default (block norm), per the visible reference code.


# --------------------------------------------------------------------------- probes
def _probe(fn):
    try:
        jax.block_until_ready(fn())
        return True
    except Exception:
        return False


def _probe_erf():
    def k(x_ref, o_ref):
        o_ref[...] = jax.lax.erf(x_ref[...])
    return pl.pallas_call(k, out_shape=jax.ShapeDtypeStruct((8, 128), jnp.float32))(
        jnp.zeros((8, 128), jnp.float32))


def _probe_single_buffer():
    def k(x_ref, w_ref, o_ref):
        o_ref[...] = x_ref[...] + w_ref[...]
    return pl.pallas_call(
        k, grid=(2,),
        in_specs=[pl.BlockSpec((8, 128), lambda i: (i, 0)),
                  pl.BlockSpec((8, 128), lambda i: (0, 0), pipeline_mode=pl.Buffered(1))],
        out_specs=pl.BlockSpec((8, 128), lambda i: (i, 0)),
        out_shape=jax.ShapeDtypeStruct((16, 128), jnp.float32),
    )(jnp.zeros((16, 128), jnp.float32), jnp.zeros((8, 128), jnp.float32))


# Probe once at module import (not inside a trace), per review feedback.
_EXACT_GELU = _probe(_probe_erf)
_SINGLE_BUFFER_OK = _probe(_probe_single_buffer)


# --------------------------------------------------------------------------- helpers
def _round_up(x, m):
    return -(-x // m) * m


def _vmem_limit_bytes():
    """Generation-specific VMEM budget (128 MiB physical on v5e/v6e, 64 MiB on v7x)."""
    try:
        kind = jax.devices()[0].device_kind.lower()
    except Exception:
        return 32 * 1024 * 1024
    if "v7" in kind:
        return 48 * 1024 * 1024
    if "v5" in kind or "v6" in kind:
        return 96 * 1024 * 1024
    return 32 * 1024 * 1024


def _compiler_params():
    return pltpu.CompilerParams(
        dimension_semantics=("parallel",),     # chunk / M axis shards across v7x's 2 TCs
        vmem_limit_bytes=_vmem_limit_bytes(),
    )


def _replicated_spec(shape):
    """Full-array block, same block every grid step (weights / biases).

    Grid-invariant blocks do not need double-buffering: single-buffer them when the
    installed Pallas supports pipeline_mode=pl.Buffered(1) (frees VMEM at large C).
    """
    nd = len(shape)
    index_map = lambda i, _nd=nd: (0,) * _nd
    if _SINGLE_BUFFER_OK:
        return pl.BlockSpec(shape, index_map, pipeline_mode=pl.Buffered(1))
    return pl.BlockSpec(shape, index_map)


def _gelu(x, exact):
    if exact:
        # PyTorch nn.GELU() default (exact, erf based) -> EUP path on TPU.
        return 0.5 * x * (1.0 + jax.lax.erf(x * (1.0 / math.sqrt(2.0))))
    # tanh fallback only if erf does not lower in this Mosaic version (~1e-3 deviation).
    c = math.sqrt(2.0 / math.pi)
    return 0.5 * x * (1.0 + jnp.tanh(c * (x + 0.044715 * x * x * x)))


# --------------------------------------------------------------------------- kernels
def _downsample_kernel(x_ref, lng_ref, lnb_ref, w_ref, b_ref, o_ref, *, eps, mxu_dtype):
    """Fused LayerNorm2d + Conv2d(k=2, s=2) on one M-tile.

    x: [4, tm, Cin] 2x2 space-to-depth patches (tap-position leading).  Each tap is
    LayerNorm'd over Cin, the 4 normalized taps are lane-concatenated and the conv is
    ONE K=4*Cin matmul (no per-tap accumulate round-trips).
    """
    g, bt = lng_ref[...], lnb_ref[...]
    taps = []
    for j in range(4):                                       # static 4-tap loop
        xj = x_ref[j].astype(jnp.float32)                    # [tm, Cin]
        mean = jnp.mean(xj, axis=-1, keepdims=True)
        var = jnp.mean(jnp.square(xj - mean), axis=-1, keepdims=True)
        taps.append((xj - mean) * jax.lax.rsqrt(var + eps) * g + bt)
    xn = jnp.concatenate(taps, axis=-1).astype(mxu_dtype)    # [tm, 4*Cin]
    y = jnp.dot(xn, w_ref[...], preferred_element_type=jnp.float32) + b_ref[...]
    o_ref[...] = y.astype(o_ref.dtype)


def _block_kernel(x_ref, wc_ref, bc_ref, lng_ref, lnb_ref,
                  w1_ref, b1_ref, w2_ref, b2_ref, ls_ref, o_ref,
                  *, ksize, pad, eps, mxu_dtype, exact_gelu):
    """Fused ConvNeXt block on one zero-padded, halo'd row-chunk.

    x: [1, th+2p, W8+2p, C] input chunk (conv halo included).  im2col happens
    IN-KERNEL from shifted VMEM views (no [M, 49*C] HBM blow-up); the dense KxK
    conv is then ONE matmul with K = ksize*ksize*C, followed by LayerNorm ->
    Linear -> GELU -> Linear -> layer-scale -> residual.
    """
    th = x_ref.shape[1] - 2 * pad
    w8 = x_ref.shape[2] - 2 * pad
    c = x_ref.shape[3]
    rows = th * w8

    # Layout work (slice / concat / reshape) is done in f32 so the (th, W8) -> rows
    # merge stays tile-aligned; matmul operands are cast to mxu_dtype just before dots.
    ximg = x_ref[0].astype(jnp.float32)                       # [th+2p, W8+2p, C]
    taps = [ximg[kh:kh + th, kw:kw + w8, :]
            for kh in range(ksize) for kw in range(ksize)]    # K*K shifted views
    patches = jnp.concatenate(taps, axis=-1)                  # [th, W8, K*K*C]
    patches = patches.reshape(rows, ksize * ksize * c)

    # --- dense KxK conv == ONE im2col matmul (MXU, f32 accumulation) ---
    y = jnp.dot(patches.astype(mxu_dtype), wc_ref[...],
                preferred_element_type=jnp.float32) + bc_ref[...]

    # --- LayerNorm over channels (channels_last), f32 math ---
    mean = jnp.mean(y, axis=-1, keepdims=True)
    var = jnp.mean(jnp.square(y - mean), axis=-1, keepdims=True)
    y = (y - mean) * jax.lax.rsqrt(var + eps) * lng_ref[...] + lnb_ref[...]

    # --- MLP: Linear -> GELU -> Linear ---
    h = jnp.dot(y.astype(mxu_dtype), w1_ref[...],
                preferred_element_type=jnp.float32) + b1_ref[...]
    h = _gelu(h, exact_gelu)
    y = jnp.dot(h.astype(mxu_dtype), w2_ref[...],
                preferred_element_type=jnp.float32) + b2_ref[...]

    # --- layer scale + residual (drop_path == identity).  The residual is the center
    #     tap of the halo'd chunk, so no separate residual input / DMA is needed. ---
    resid = ximg[pad:pad + th, pad:pad + w8, :].reshape(rows, c)
    # TODO(synk): for C < 128 the (rows, C) store is lane-masked; a lane-dense packed
    #             output layout (or C padded to a multiple of 128) would remove it.
    o_ref[...] = (y * ls_ref[...] + resid).astype(o_ref.dtype)


# --------------------------------------------------------------------------- wrappers
def _downsample(x_nhwc, p, *, mxu_dtype, block_m):
    N, H, W, Cin = x_nhwc.shape
    Cout = p["wconv"].shape[1]
    Ho, Wo = H // 2, W // 2
    M = N * Ho * Wo

    # 2x2 / stride-2 space-to-depth (pure layout glue); feature order (kh, kw, cin)
    # matches the flattened conv weight.  Streamed in mxu_dtype (bf16 halves DMA).
    patches = (
        x_nhwc.reshape(N, Ho, 2, Wo, 2, Cin)
        .transpose(2, 4, 0, 1, 3, 5)
        .reshape(4, M, Cin)
    ).astype(mxu_dtype)

    tm = max(16, (min(block_m, M) // 16) * 16)      # multiple of 16 for bf16 sublane pack
    Mpad = _round_up(M, tm)                         # pad M, never shrink / grow the tile
    if Mpad != M:
        patches = jnp.pad(patches, ((0, 0), (0, Mpad - M), (0, 0)))

    kernel = functools.partial(_downsample_kernel, eps=_LN2D_EPS, mxu_dtype=mxu_dtype)
    y = pl.pallas_call(
        kernel,
        grid=(Mpad // tm,),
        in_specs=[
            pl.BlockSpec((4, tm, Cin), lambda i: (0, i, 0)),
            _replicated_spec((1, Cin)),
            _replicated_spec((1, Cin)),
            _replicated_spec(p["wconv"].shape),
            _replicated_spec(p["bconv"].shape),
        ],
        out_specs=pl.BlockSpec((tm, Cout), lambda i: (i, 0)),
        out_shape=jax.ShapeDtypeStruct((Mpad, Cout), x_nhwc.dtype),
        compiler_params=_compiler_params(),
    )(patches, p["lng"], p["lnb"], p["wconv"].astype(mxu_dtype), p["bconv"])
    return y[:M].reshape(N, Ho, Wo, Cout)


def _convnext_block(x_nhwc, p, *, ksize, mxu_dtype, block_m, exact_gelu):
    N, H, W, C = x_nhwc.shape
    pad = (ksize - 1) // 2                # dilation == 1 only (stage default dilation=(1,1))
    W8 = _round_up(W, 8)                  # keeps the in-kernel (th, W8)->rows merge tile-aligned
    th = max(1, min(H, block_m // W8))    # output rows per chunk
    nH = -(-H // th)
    Hp = nH * th
    rows = th * W8
    hidden = p["w1"].shape[1]

    # Zero-pad (conv halo + H/W round-up), then gather overlapping halo'd row-chunks.
    # HBM duplication is (th + 2*pad)/th (~1.1-1.4x) instead of the 49x im2col blow-up;
    # the 49 taps are built in-kernel from shifted VMEM views of each chunk.
    xpad = jnp.pad(x_nhwc, ((0, 0), (pad, Hp - H + pad), (pad, W8 - W + pad), (0, 0)))
    row_idx = (jnp.arange(nH) * th)[:, None] + jnp.arange(th + 2 * pad)[None, :]
    chunks = xpad[:, row_idx].reshape(N * nH, th + 2 * pad, W8 + 2 * pad, C)
    chunks = chunks.astype(mxu_dtype)     # bf16-resident streaming input (halves DMA)

    kernel = functools.partial(_block_kernel, ksize=ksize, pad=pad, eps=_LN_EPS,
                               mxu_dtype=mxu_dtype, exact_gelu=exact_gelu)
    y = pl.pallas_call(
        kernel,
        grid=(N * nH,),
        in_specs=[
            pl.BlockSpec((1, th + 2 * pad, W8 + 2 * pad, C), lambda g: (g, 0, 0, 0)),
            _replicated_spec(p["wconv"].shape),       # [K*K*C, C]
            _replicated_spec((1, C)),
            _replicated_spec((1, C)),
            _replicated_spec((1, C)),
            _replicated_spec((C, hidden)),
            _replicated_spec((1, hidden)),
            _replicated_spec((hidden, C)),
            _replicated_spec((1, C)),
            _replicated_spec((1, C)),
        ],
        out_specs=pl.BlockSpec((rows, C), lambda g: (g, 0)),
        out_shape=jax.ShapeDtypeStruct((N * nH * rows, C), x_nhwc.dtype),
        compiler_params=_compiler_params(),
    )(chunks, p["wconv"].astype(mxu_dtype), p["bconv"], p["lng"], p["lnb"],
      p["w1"].astype(mxu_dtype), p["b1"], p["w2"].astype(mxu_dtype), p["b2"], p["ls"])
    return y.reshape(N, Hp, W8, C)[:, :H, :W, :]


def convnext_stage(x_nchw, params, *, kernel_size=7, mxu_dtype=jnp.bfloat16, block_m=512):
    """ConvNeXtStage forward.  mxu_dtype=bf16 (default) streams inputs/weights in bf16
    with f32 accumulation; pass jnp.float32 for bit-closer-to-reference numerics."""
    x = jnp.transpose(x_nchw, (0, 2, 3, 1))          # NCHW -> NHWC
    x = _downsample(x, params["downsample"], mxu_dtype=mxu_dtype, block_m=block_m)
    for bp in params["blocks"]:
        x = _convnext_block(x, bp, ksize=kernel_size, mxu_dtype=mxu_dtype,
                            block_m=block_m, exact_gelu=_EXACT_GELU)
    return jnp.transpose(x, (0, 3, 1, 2))            # NHWC -> NCHW


# --------------------------------------------------------------------------- params
def init_params(key, in_chs=4, out_chs=8, depth=2, kernel_size=7, mlp_ratio=4,
                ls_init_value=1.0):
    hidden = int(mlp_ratio * out_chs)
    keys = jax.random.split(key, 2 + depth * 6)
    ki = iter(range(len(keys)))

    # --- downsample: LayerNorm2d(in_chs) + Conv2d(in->out, k=2, s=2, bias) ---
    w_ds = jax.random.normal(keys[next(ki)], (out_chs, in_chs, 2, 2), jnp.float32) * 0.1
    b_ds = jax.random.normal(keys[next(ki)], (out_chs,), jnp.float32) * 0.1
    downsample = dict(
        lng=jnp.ones((1, in_chs), jnp.float32),       # nn.LayerNorm init
        lnb=jnp.zeros((1, in_chs), jnp.float32),
        # [Cout, Cin, 2, 2] -> [(kh, kw, cin), Cout]
        wconv=jnp.transpose(w_ds, (2, 3, 1, 0)).reshape(4 * in_chs, out_chs),
        bconv=b_ds.reshape(1, out_chs),
    )

    blocks = []
    for _ in range(depth):
        w_cv = jax.random.normal(
            keys[next(ki)], (out_chs, out_chs, kernel_size, kernel_size), jnp.float32) * 0.05
        b_cv = jax.random.normal(keys[next(ki)], (out_chs,), jnp.float32) * 0.05
        w1 = jax.random.normal(keys[next(ki)], (hidden, out_chs), jnp.float32) * 0.1
        b1 = jax.random.normal(keys[next(ki)], (hidden,), jnp.float32) * 0.1
        w2 = jax.random.normal(keys[next(ki)], (out_chs, hidden), jnp.float32) * 0.1
        b2 = jax.random.normal(keys[next(ki)], (out_chs,), jnp.float32) * 0.1
        blocks.append(dict(
            # [Cout, Cin, K, K] -> [(kh, kw, cin), Cout]  (dense conv, no groups in ref)
            wconv=jnp.transpose(w_cv, (2, 3, 1, 0)).reshape(
                kernel_size * kernel_size * out_chs, out_chs),
            bconv=b_cv.reshape(1, out_chs),
            lng=jnp.ones((1, out_chs), jnp.float32),
            lnb=jnp.zeros((1, out_chs), jnp.float32),
            w1=w1.T, b1=b1.reshape(1, hidden),        # torch Linear weight is [out, in]
            w2=w2.T, b2=b2.reshape(1, out_chs),
            ls=jnp.full((1, out_chs), ls_init_value, jnp.float32),
        ))
    return dict(downsample=downsample, blocks=blocks)


# --------------------------------------------------------------------------- reference
def _reference_stage(x_nchw, params, *, kernel_size=7, exact_gelu=True):
    """Plain-JAX (XLA) reference for correctness checking of the Pallas kernels."""
    hp = jax.lax.Precision.HIGHEST
    x = jnp.transpose(x_nchw, (0, 2, 3, 1)).astype(jnp.float32)
    N, H, W, Cin = x.shape
    ds = params["downsample"]
    mean = jnp.mean(x, -1, keepdims=True)
    var = jnp.var(x, -1, keepdims=True)
    xn = (x - mean) * jax.lax.rsqrt(var + _LN2D_EPS) * ds["lng"][0] + ds["lnb"][0]
    cout = ds["bconv"].shape[-1]
    w_ds = ds["wconv"].reshape(2, 2, Cin, cout)       # HWIO
    x = jax.lax.conv_general_dilated(
        xn, w_ds, window_strides=(2, 2), padding="VALID",
        dimension_numbers=("NHWC", "HWIO", "NHWC"), precision=hp) + ds["bconv"][0]
    for bp in params["blocks"]:
        C = x.shape[-1]
        k = kernel_size
        pad = (k - 1) // 2
        w = bp["wconv"].reshape(k, k, C, C)           # HWIO
        y = jax.lax.conv_general_dilated(
            x, w, window_strides=(1, 1), padding=((pad, pad), (pad, pad)),
            dimension_numbers=("NHWC", "HWIO", "NHWC"), precision=hp) + bp["bconv"][0]
        mean = jnp.mean(y, -1, keepdims=True)
        var = jnp.var(y, -1, keepdims=True)
        y = (y - mean) * jax.lax.rsqrt(var + _LN_EPS) * bp["lng"][0] + bp["lnb"][0]
        h = jnp.einsum("nhwc,cd->nhwd", y, bp["w1"], precision=hp) + bp["b1"][0]
        h = _gelu(h, exact_gelu)
        y = jnp.einsum("nhwd,dc->nhwc", h, bp["w2"], precision=hp) + bp["b2"][0]
        x = y * bp["ls"][0] + x
    return jnp.transpose(x, (0, 3, 1, 2))


# --------------------------------------------------------------------------- main
if __name__ == "__main__":
    key = jax.random.PRNGKey(0)
    kx, kp = jax.random.split(key)

    # ConvNeXtStage(in_chs=4, out_chs=8, stride=2, depth=2)
    x = jax.random.normal(kx, (2, 4, 16, 16), jnp.float32)   # NCHW
    params = init_params(kp, in_chs=4, out_chs=8, depth=2)

    # block_m=64 so the toy problem exercises multi-step "parallel" grids
    # (downsample grid=(2,), each block grid=(2,)) -> both v7x TCs get work.
    # f32 MXU path first: tight comparison against the plain-JAX reference.
    y32 = convnext_stage(x, params, mxu_dtype=jnp.float32, block_m=64)
    y32 = jax.block_until_ready(y32)
    assert y32.shape == (2, 8, 8, 8), y32.shape              # N, out_chs, H/2, W/2
    assert bool(jnp.all(jnp.isfinite(y32)))

    y_ref = _reference_stage(x, params, exact_gelu=_EXACT_GELU)
    err32 = float(jnp.max(jnp.abs(y32 - y_ref)))
    assert err32 < 2e-2, err32        # covers MXU precision-mode differences; structural bugs are O(0.1+)

    # Default path: bf16-resident streaming inputs / weights, f32 accumulation.
    ybf = jax.block_until_ready(convnext_stage(x, params, block_m=64))
    assert ybf.shape == (2, 8, 8, 8), ybf.shape
    assert bool(jnp.all(jnp.isfinite(ybf)))
    errbf = float(jnp.max(jnp.abs(ybf.astype(jnp.float32) - y_ref)))
    assert errbf < 0.25, errbf

    print("KERNEL_OK")
</pallas_src>

<mosaic_0001>
module attributes {stable_mosaic.version = 11 : i64} {
  func.func @k(%arg0: memref<8x128xf32, #tpu.memory_space<vmem>>, %arg1: memref<8x128xf32, #tpu.memory_space<vmem>>) attributes {dimension_semantics = [], scalar_prefetch = 0 : i64, scratch_operands = 0 : i64, tpu.core_type = #tpu.core_type<tc>} {
    %c0 = arith.constant 0 : index
    %c0_0 = arith.constant 0 : index
    %0 = vector.load %arg0[%c0, %c0_0] : memref<8x128xf32, #tpu.memory_space<vmem>>, vector<8x128xf32>
    %1 = math.erf %0 : vector<8x128xf32>
    %c0_1 = arith.constant 0 : index
    %c0_2 = arith.constant 0 : index
    %2 = vector.load %arg1[%c0_1, %c0_2] : memref<8x128xf32, #tpu.memory_space<vmem>>, vector<8x128xf32>
    tpu.vector_store %arg1[%c0_1, %c0_2], %1 {strides = array<i32>} : memref<8x128xf32, #tpu.memory_space<vmem>>, vector<8x128xf32>,
    return
  }
}

module attributes {stable_mosaic.version = 11 : i64} {
  func.func @k(%arg0: i32, %arg1: memref<8x128xf32, #tpu.memory_space<vmem>>, %arg2: memref<8x128xf32, #tpu.memory_space<vmem>>, %arg3: memref<8x128xf32, #tpu.memory_space<vmem>>) attributes {dimension_semantics = [#tpu.dimension_semantics<arbitrary>], iteration_bounds = array<i64: 2>, scalar_prefetch = 0 : i64, scratch_operands = 0 : i64, tpu.core_type = #tpu.core_type<tc>, window_params = [{transform_indices = @transform_0, window_bounds = array<i64: 8, 128>}, {pipeline_mode = #tpu.pipeline_mode<synchronous>, transform_indices = @transform_1, window_bounds = array<i64: 8, 128>}, {transform_indices = @transform_2, window_bounds = array<i64: 8, 128>}]} {
    %c0 = arith.constant 0 : index
    %c0_0 = arith.constant 0 : index
    %0 = vector.load %arg1[%c0, %c0_0] : memref<8x128xf32, #tpu.memory_space<vmem>>, vector<8x128xf32>
    %c0_1 = arith.constant 0 : index
    %c0_2 = arith.constant 0 : index
    %1 = vector.load %arg2[%c0_1, %c0_2] : memref<8x128xf32, #tpu.memory_space<vmem>>, vector<8x128xf32>
    %2 = arith.addf %0, %1 : vector<8x128xf32>
    %c0_3 = arith.constant 0 : index
    %c0_4 = arith.constant 0 : index
    %3 = vector.load %arg3[%c0_3, %c0_4] : memref<8x128xf32, #tpu.memory_space<vmem>>, vector<8x128xf32>
    tpu.vector_store %arg3[%c0_3, %c0_4], %2 {strides = array<i32>} : memref<8x128xf32, #tpu.memory_space<vmem>>, vector<8x128xf32>,
    return
  }
  func.func @transform_0(%arg0: i32) -> (i32, i32) {
    %c0_i32 = arith.constant 0 : i32
    %c0_i32_0 = arith.constant 0 : i32
    return %arg0, %c0_i32 : i32, i32
  }
  func.func @transform_1(%arg0: i32) -> (i32, i32) {
    %c0_i32 = arith.constant 0 : i32
    %c0_i32_0 = arith.constant 0 : i32
    %c0_i32_1 = arith.constant 0 : i32
    return %c0_i32, %c0_i32_0 : i32, i32
  }
  func.func @transform_2(%arg0: i32) -> (i32, i32) {
    %c0_i32 = arith.constant 0 : i32
    %c0_i32_0 = arith.constant 0 : i32
    return %arg0, %c0_i32 : i32, i32
  }
}

module attributes {stable_mosaic.version = 11 : i64} {
  func.func @_downsample_kernel(%arg0: i32, %arg1: memref<4x64x4xf32, #tpu.memory_space<vmem>>, %arg2: memref<1x4xf32, #tpu.memory_space<vmem>>, %arg3: memref<1x4xf32, #tpu.memory_space<vmem>>, %arg4: memref<16x8xf32, #tpu.memory_space<vmem>>, %arg5: memref<1x8xf32, #tpu.memory_space<vmem>>, %arg6: memref<64x8xf32, #tpu.memory_space<vmem>>) attributes {dimension_semantics = [#tpu.dimension_semantics<parallel>], iteration_bounds = array<i64: 2>, scalar_prefetch = 0 : i64, scratch_operands = 0 : i64, tpu.core_type = #tpu.core_type<tc>, window_params = [{transform_indices = @transform_0, window_bounds = array<i64: 4, 64, 4>}, {pipeline_mode = #tpu.pipeline_mode<synchronous>, transform_indices = @transform_1, window_bounds = array<i64: 1, 4>}, {pipeline_mode = #tpu.pipeline_mode<synchronous>, transform_indices = @transform_2, window_bounds = array<i64: 1, 4>}, {pipeline_mode = #tpu.pipeline_mode<synchronous>, transform_indices = @transform_3, window_bounds = array<i64: 16, 8>}, {pipeline_mode = #tpu.pipeline_mode<synchronous>, transform_indices = @transform_4, window_bounds = array<i64: 1, 8>}, {transform_indices = @transform_5, window_bounds = array<i64: 64, 8>}]} {
    %c0 = arith.constant 0 : index
    %c0_0 = arith.constant 0 : index
    %0 = vector.load %arg2[%c0, %c0_0] : memref<1x4xf32, #tpu.memory_space<vmem>>, vector<1x4xf32>
    %c0_1 = arith.constant 0 : index
    %c0_2 = arith.constant 0 : index
    %1 = vector.load %arg3[%c0_1, %c0_2] : memref<1x4xf32, #tpu.memory_space<vmem>>, vector<1x4xf32>
    %c0_3 = arith.constant 0 : index
    %c0_4 = arith.constant 0 : index
    %c0_5 = arith.constant 0 : index
    %2 = vector.load %arg1[%c0_3, %c0_4, %c0_5] : memref<4x64x4xf32, #tpu.memory_space<vmem>>, vector<1x64x4xf32>
    %3 = vector.shape_cast %2 : vector<1x64x4xf32> to vector<64x4xf32>
    %cst = arith.constant dense<0.000000e+00> : vector<64xf32>
    %4 = vector.multi_reduction <add>, %3, %cst [1] : vector<64x4xf32> to vector<64xf32>
    %5 = vector.shape_cast %4 : vector<64xf32> to vector<64x1xf32>
    %cst_6 = arith.constant 4.000000e+00 : f32
    %6 = vector.broadcast %cst_6 : f32 to vector<64x1xf32>
    %7 = arith.divf %5, %6 : vector<64x1xf32>
    %8 = vector.broadcast %7 : vector<64x1xf32> to vector<64x4xf32>
    %9 = arith.subf %3, %8 : vector<64x4xf32>
    %10 = arith.mulf %9, %9 : vector<64x4xf32>
    %cst_7 = arith.constant dense<0.000000e+00> : vector<64xf32>
    %11 = vector.multi_reduction <add>, %10, %cst_7 [1] : vector<64x4xf32> to vector<64xf32>
    %12 = vector.shape_cast %11 : vector<64xf32> to vector<64x1xf32>
    %cst_8 = arith.constant 4.000000e+00 : f32
    %13 = vector.broadcast %cst_8 : f32 to vector<64x1xf32>
    %14 = arith.divf %12, %13 : vector<64x1xf32>
    %15 = vector.broadcast %7 : vector<64x1xf32> to vector<64x4xf32>
    %16 = arith.subf %3, %15 : vector<64x4xf32>
    %cst_9 = arith.constant 9.99999997E-7 : f32
    %17 = vector.broadcast %cst_9 : f32 to vector<64x1xf32>
    %18 = arith.addf %14, %17 : vector<64x1xf32>
    %19 = math.rsqrt %18 : vector<64x1xf32>
    %20 = vector.broadcast %19 : vector<64x1xf32> to vector<64x4xf32>
    %21 = arith.mulf %16, %20 : vector<64x4xf32>
    %22 = vector.broadcast %0 : vector<1x4xf32> to vector<64x4xf32>
    %23 = arith.mulf %21, %22 : vector<64x4xf32>
    %24 = vector.broadcast %1 : vector<1x4xf32> to vector<64x4xf32>
    %25 = arith.addf %23, %24 : vector<64x4xf32>
    %c1 = arith.constant 1 : index
    %c0_10 = arith.constant 0 : index
    %c0_11 = arith.constant 0 : index
    %26 = vector.load %arg1[%c1, %c0_10, %c0_11] : memref<4x64x4xf32, #tpu.memory_space<vmem>>, vector<1x64x4xf32>
    %27 = vector.shape_cast %26 : vector<1x64x4xf32> to vector<64x4xf32>
    %cst_12 = arith.constant dense<0.000000e+00> : vector<64xf32>
    %28 = vector.multi_reduction <add>, %27, %cst_12 [1] : vector<64x4xf32> to vector<64xf32>
    %29 = vector.shape_cast %28 : vector<64xf32> to vector<64x1xf32>
    %cst_13 = arith.constant 4.000000e+00 : f32
    %30 = vector.broadcast %cst_13 : f32 to vector<64x1xf32>
    %31 = arith.divf %29, %30 : vector<64x1xf32>
    %32 = vector.broadcast %31 : vector<64x1xf32> to vector<64x4xf32>
    %33 = arith.subf %27, %32 : vector<64x4xf32>
    %34 = arith.mulf %33, %33 : vector<64x4xf32>
    %cst_14 = arith.constant dense<0.000000e+00> : vector<64xf32>
    %35 = vector.multi_reduction <add>, %34, %cst_14 [1] : vector<64x4xf32> to vector<64xf32>
    %36 = vector.shape_cast %35 : vector<64xf32> to vector<64x1xf32>
    %cst_15 = arith.constant 4.000000e+00 : f32
    %37 = vector.broadcast %cst_15 : f32 to vector<64x1xf32>
    %38 = arith.divf %36, %37 : vector<64x1xf32>
    %39 = vector.broadcast %31 : vector<64x1xf32> to vector<64x4xf32>
    %40 = arith.subf %27, %39 : vector<64x4xf32>
    %cst_16 = arith.constant 9.99999997E-7 : f32
    %41 = vector.broadcast %cst_16 : f32 to vector<64x1xf32>
    %42 = arith.addf %38, %41 : vector<64x1xf32>
    %43 = math.rsqrt %42 : vector<64x1xf32>
    %44 = vector.broadcast %43 : vector<64x1xf32> to vector<64x4xf32>
    %45 = arith.mulf %40, %44 : vector<64x4xf32>
    %46 = vector.broadcast %0 : vector<1x4xf32> to vector<64x4xf32>
    %47 = arith.mulf %45, %46 : vector<64x4xf32>
    %48 = vector.broadcast %1 : vector<1x4xf32> to vector<64x4xf32>
    %49 = arith.addf %47, %48 : vector<64x4xf32>
    %c2 = arith.constant 2 : index
    %c0_17 = arith.constant 0 : index
    %c0_18 = arith.constant 0 : index
    %50 = vector.load %arg1[%c2, %c0_17, %c0_18] : memref<4x64x4xf32, #tpu.memory_space<vmem>>, vector<1x64x4xf32>
    %51 = vector.shape_cast %50 : vector<1x64x4xf32> to vector<64x4xf32>
    %cst_19 = arith.constant dense<0.000000e+00> : vector<64xf32>
    %52 = vector.multi_reduction <add>, %51, %cst_19 [1] : vector<64x4xf32> to vector<64xf32>
    %53 = vector.shape_cast %52 : vector<64xf32> to vector<64x1xf32>
    %cst_20 = arith.constant 4.000000e+00 : f32
    %54 = vector.broadcast %cst_20 : f32 to vector<64x1xf32>
    %55 = arith.divf %53, %54 : vector<64x1xf32>
    %56 = vector.broadcast %55 : vector<64x1xf32> to vector<64x4xf32>
    %57 = arith.subf %51, %56 : vector<64x4xf32>
    %58 = arith.mulf %57, %57 : vector<64x4xf32>
    %cst_21 = arith.constant dense<0.000000e+00> : vector<64xf32>
    %59 = vector.multi_reduction <add>, %58, %cst_21 [1] : vector<64x4xf32> to vector<64xf32>
    %60 = vector.shape_cast %59 : vector<64xf32> to vector<64x1xf32>
    %cst_22 = arith.constant 4.000000e+00 : f32
    %61 = vector.broadcast %cst_22 : f32 to vector<64x1xf32>
    %62 = arith.divf %60, %61 : vector<64x1xf32>
    %63 = vector.broadcast %55 : vector<64x1xf32> to vector<64x4xf32>
    %64 = arith.subf %51, %63 : vector<64x4xf32>
    %cst_23 = arith.constant 9.99999997E-7 : f32
    %65 = vector.broadcast %cst_23 : f32 to vector<64x1xf32>
    %66 = arith.addf %62, %65 : vector<64x1xf32>
    %67 = math.rsqrt %66 : vector<64x1xf32>
    %68 = vector.broadcast %67 : vector<64x1xf32> to vector<64x4xf32>
    %69 = arith.mulf %64, %68 : vector<64x4xf32>
    %70 = vector.broadcast %0 : vector<1x4xf32> to vector<64x4xf32>
    %71 = arith.mulf %69, %70 : vector<64x4xf32>
    %72 = vector.broadcast %1 : vector<1x4xf32> to vector<64x4xf32>
    %73 = arith.addf %71, %72 : vector<64x4xf32>
    %c3 = arith.constant 3 : index
    %c0_24 = arith.constant 0 : index
    %c0_25 = arith.constant 0 : index
    %74 = vector.load %arg1[%c3, %c0_24, %c0_25] : memref<4x64x4xf32, #tpu.memory_space<vmem>>, vector<1x64x4xf32>
    %75 = vector.shape_cast %74 : vector<1x64x4xf32> to vector<64x4xf32>
    %cst_26 = arith.constant dense<0.000000e+00> : vector<64xf32>
    %76 = vector.multi_reduction <add>, %75, %cst_26 [1] : vector<64x4xf32> to vector<64xf32>
    %77 = vector.shape_cast %76 : vector<64xf32> to vector<64x1xf32>
    %cst_27 = arith.constant 4.000000e+00 : f32
    %78 = vector.broadcast %cst_27 : f32 to vector<64x1xf32>
    %79 = arith.divf %77, %78 : vector<64x1xf32>
    %80 = vector.broadcast %79 : vector<64x1xf32> to vector<64x4xf32>
    %81 = arith.subf %75, %80 : vector<64x4xf32>
    %82 = arith.mulf %81, %81 : vector<64x4xf32>
    %cst_28 = arith.constant dense<0.000000e+00> : vector<64xf32>
    %83 = vector.multi_reduction <add>, %82, %cst_28 [1] : vector<64x4xf32> to vector<64xf32>
    %84 = vector.shape_cast %83 : vector<64xf32> to vector<64x1xf32>
    %cst_29 = arith.constant 4.000000e+00 : f32
    %85 = vector.broadcast %cst_29 : f32 to vector<64x1xf32>
    %86 = arith.divf %84, %85 : vector<64x1xf32>
    %87 = vector.broadcast %79 : vector<64x1xf32> to vector<64x4xf32>
    %88 = arith.subf %75, %87 : vector<64x4xf32>
    %cst_30 = arith.constant 9.99999997E-7 : f32
    %89 = vector.broadcast %cst_30 : f32 to vector<64x1xf32>
    %90 = arith.addf %86, %89 : vector<64x1xf32>
    %91 = math.rsqrt %90 : vector<64x1xf32>
    %92 = vector.broadcast %91 : vector<64x1xf32> to vector<64x4xf32>
    %93 = arith.mulf %88, %92 : vector<64x4xf32>
    %94 = vector.broadcast %0 : vector<1x4xf32> to vector<64x4xf32>
    %95 = arith.mulf %93, %94 : vector<64x4xf32>
    %96 = vector.broadcast %1 : vector<1x4xf32> to vector<64x4xf32>
    %97 = arith.addf %95, %96 : vector<64x4xf32>
    %98 = tpu.concatenate %25, %49, %73, %97 in 1 : vector<64x4xf32>, vector<64x4xf32>, vector<64x4xf32>, vector<64x4xf32> -> vector<64x16xf32>
    %c0_31 = arith.constant 0 : index
    %c0_32 = arith.constant 0 : index
    %99 = vector.load %arg4[%c0_31, %c0_32] : memref<16x8xf32, #tpu.memory_space<vmem>>, vector<16x8xf32>
    %cst_33 = arith.constant dense<0.000000e+00> : vector<64x8xf32>
    %100 = tpu.matmul %98, %99, %cst_33 {dimension_numbers = #tpu.dot_dimension_numbers<[1], [0], [0], [1], [0, 0, 1, 1], [], []>} : vector<64x16xf32>, vector<16x8xf32>, vector<64x8xf32> -> vector<64x8xf32>
    %c0_34 = arith.constant 0 : index
    %c0_35 = arith.constant 0 : index
    %101 = vector.load %arg5[%c0_34, %c0_35] : memref<1x8xf32, #tpu.memory_space<vmem>>, vector<1x8xf32>
    %102 = vector.broadcast %101 : vector<1x8xf32> to vector<64x8xf32>
    %103 = arith.addf %100, %102 : vector<64x8xf32>
    %c0_36 = arith.constant 0 : index
    %c0_37 = arith.constant 0 : index
    %104 = vector.load %arg6[%c0_36, %c0_37] : memref<64x8xf32, #tpu.memory_space<vmem>>, vector<64x8xf32>
    tpu.vector_store %arg6[%c0_36, %c0_37], %103 {strides = array<i32>} : memref<64x8xf32, #tpu.memory_space<vmem>>, vector<64x8xf32>,
    return
  }
  func.func @transform_0(%arg0: i32) -> (i32, i32, i32) {
    %c0_i32 = arith.constant 0 : i32
    %c0_i32_0 = arith.constant 0 : i32
    %c0_i32_1 = arith.constant 0 : i32
    return %c0_i32, %arg0, %c0_i32_0 : i32, i32, i32
  }
  func.func @transform_1(%arg0: i32) -> (i32, i32) {
    %c0_i32 = arith.constant 0 : i32
    %c0_i32_0 = arith.constant 0 : i32
    %c0_i32_1 = arith.constant 0 : i32
    return %c0_i32, %c0_i32_0 : i32, i32
  }
  func.func @transform_2(%arg0: i32) -> (i32, i32) {
    %c0_i32 = arith.constant 0 : i32
    %c0_i32_0 = arith.constant 0 : i32
    %c0_i32_1 = arith.constant 0 : i32
    return %c0_i32, %c0_i32_0 : i32, i32
  }
  func.func @transform_3(%arg0: i32) -> (i32, i32) {
    %c0_i32 = arith.constant 0 : i32
    %c0_i32_0 = arith.constant 0 : i32
    %c0_i32_1 = arith.constant 0 : i32
    return %c0_i32, %c0_i32_0 : i32, i32
  }
  func.func @transform_4(%arg0: i32) -> (i32, i32) {
    %c0_i32 = arith.constant 0 : i32
    %c0_i32_0 = arith.constant 0 : i32
    %c0_i32_1 = arith.constant 0 : i32
    return %c0_i32, %c0_i32_0 : i32, i32
  }
  func.func @transform_5(%arg0: i32) -> (i32, i32) {
    %c0_i32 = arith.constant 0 : i32
    %c0_i32_0 = arith.constant 0 : i32
    return %arg0, %c0_i32 : i32, i32
  }
}

</mosaic_0001>

<bundles_post_ra>
// kernel: tpu_custom_call.1
= control target key start
LH: loop header
LB: loop body
LE: loop exit
PB: predicated region body
PF: predicated region fallthrough
CT: control target
= control target key end

     0   :  { %6 = vsyncpa [#allocation3], 0  ;;  %s127_s0 = inlined_call_operand.hbm [shape: f32[8,128], index: 0, kind: input, shape index: {}]   ;;  %s128_s1 = inlined_call_operand.hbm [shape: f32[8,128], index: 1, kind: output, shape index: {}]  }
   0x1   :  { %7 = vsyncpa [#allocation4], 0  ;;  %s91_s6 = smov [#allocation2]   ;;  %s43_s10 = scalar_lea.hbm %s127_s0, 128 }
   0x2   :  { %s14_s7 = sshll.u32 %s91_s6, 4  ;;  %p44_p0 = scmp.ne.s32.totalorder %s127_s0, %s43_s10  ;;  %s15_s7 = int_to_ptr.vmem [resolvable:$true] %s14_s7 }
   0x3   :  { %p47_p1 = scmp.lt.u32.totalorder %s43_s10, %s127_s0 }
   0x5   :  { %p49_p2 = pnand %p47_p1, %p44_p0 }
   0x7   :  { %52 = shalt.err (!%p49_p2)
}
   0x8   :  { %s53_s15 = scalar_lea.vmem %s15_s7, 128  ;;  %p58_p4 = scmp.lt.s32.totalorder %s15_s7, %s15_s7 }
   0x9   :  { %p54_p3 = scmp.ne.s32.totalorder %s15_s7, %s53_s15  ;;  %p59_p5 = scmp.lt.s32.totalorder %s53_s15, %s53_s15 }
   0xb   :  { %p60_p6 = por %p59_p5, %p58_p4 }
   0xd   :  { %p61_p7 = pnand %p60_p6, %p54_p3 }
   0xf   :  { %64 = shalt.err (!%p61_p7)
}
  0x10   :  { %17 = dma.hbm_to_vmem [thread:$0]  %s127_s0, 128, %s15_s7, [#allocation3]  }
  0x11   :  { %87 = dma.done.wait [#allocation3], 128  }
  0x12   :  { %88 = vsyncadd [#allocation3], 4294967168  ;;  %v21_v0 = vld [vmem:[#allocation2] sm:$0xff]  ;;  %s92_s18 = smov [#allocation5]  }
  0x13   :  { %41 = verf.f32 %v21_v0  ;;  %s30_s19 = sshll.u32 %s92_s18, 4  ;;  %s31_s19 = int_to_ptr.vmem [resolvable:$true] %s30_s19 }
  0x14   :  { %s65_s20 = scalar_lea.vmem %s31_s19, 128  ;;  %p70_p9 = scmp.lt.s32.totalorder %s31_s19, %s31_s19 }
  0x15   :  { %p66_p8 = scmp.ne.s32.totalorder %s31_s19, %s65_s20  ;;  %p71_p10 = scmp.lt.s32.totalorder %s65_s20, %s65_s20 }
  0x17   :  { %p72_p11 = por %p71_p10, %p70_p9 }
  0x19   :  { %p73_p12 = pnand %p72_p11, %p66_p8 }
  0x1d   :  { %v42_v1 = vpop.eup %41 }
  0x1e   :  { %23 = vst [vmem:[#allocation5] sm:$0xff] %v42_v1 }
  0x1f   :  { %76 = shalt.err (!%p73_p12)
}
  0x20   :  { %s77_s0 = scalar_lea.hbm %s128_s1, 128 }
  0x21   :  { %p78_p13 = scmp.ne.s32.totalorder %s128_s1, %s77_s0  ;;  %p81_p0 = scmp.lt.u32.totalorder %s77_s0, %s128_s1 }
  0x23   :  { %p83_p1 = pnand %p81_p0, %p78_p13 }
  0x25   :  { %86 = shalt.err (!%p83_p1)
}
  0x26   :  { %33 = dma.vmem_to_hbm [thread:$0]  %s31_s19, 128, %s128_s1, [#allocation4]  }
  0x27   :  { %89 = dma.done.wait [#allocation4], 128  }
  0x28   :  { %90 = vsyncadd [#allocation4], 4294967168 }
  0x29   :  { %37 = vsyncpa [#allocation3], 1 }
  0x2a   :  { %38 = vsyncpa [#allocation4], 1 }

// kernel: tpu_custom_call.1
= control target key start
LH: loop header
LB: loop body
LE: loop exit
PB: predicated region body
PF: predicated region fallthrough
CT: control target
= control target key end

     0   :  { %7 = vsyncpa [#allocation3], 0  ;;  %s690_s0 = inlined_call_operand.hbm [shape: f32[16,128], index: 0, kind: input, shape index: {}]   ;;  %s691_s1 = inlined_call_operand.hbm [shape: f32[8,128], index: 1, kind: input, shape index: {}]   ;;  %s692_s2 = inlined_call_operand.hbm [shape: f32[16,128], index: 2, kind: output, shape index: {}]  }
   0x1   :  { %9 = vsyncpa [#allocation3 + $0x1], 0 }
   0x2   :  { %10 = vsyncpa [#allocation6], 0 }
   0x3   :  { %11 = vsyncpa [#allocation4], 0 }
   0x4   :  { %13 = vsyncpa [#allocation4 + $0x1], 0  ;;  %s489_s9 = smov 0   ;;  %s491_s10 = smov 0  }
   0x5   :  { %s493_s11 = smov 0   ;;  %s495_s12 = smov 0  }
   0x6 LB: > { %s510_s13 = sadd.s32 4294967295, %s469_s12   ;;  %s270_s14 = sadd.s32 4294967294, %s469_s12   ;;  %s469_s12 = sphi %s495_s12, %s716_s12   ;;  %s465_s11 = sphi %s493_s11, %s715_s11   ;;  %s461_s10 = sphi %s491_s10, %s714_s10   ;;  %s457_s9 = sphi %s489_s9, %s713_s9  }
   0x7   : > { %p39_p0 = scmp.ne.s32.totalorder %s461_s10, %s457_s9  ;;  %p693_p1 = scmp.eq.s32.totalorder %s510_s13, 0 }
   0x8   : > { %p90_p3 = scmp.eq.s32.totalorder %s270_s14, 1  ;;  %p271_p5 = scmp.ge.s32.totalorder %s469_s12, 1 }
   0x9   : > { %p519_p4 = por %p693_p1, %p39_p0  ;;  %p97_p7 = scmp.lt.s32.totalorder %s469_s12, 3 }
   0xa   : > { %p524_p6 = por %p90_p3, %p39_p0  ;;  %s471_s18 = smov [#allocation5]  }
   0xb   : > { %s696_s15 = scalar_select %p519_p4, 1, 0 }
   0xc   : > { %s697_s16 = scalar_select %p524_p6, 1, 0 }
   0xd   : > { %p529_p8 = pnand %p271_p5, %p97_p7  ;;  %s110_s19 = sshll.u32 %s471_s18, 4  ;;  %s111_s19 = int_to_ptr.vmem [resolvable:$true] %s110_s19 }
   0xe   : > { %s537_s20 = sadd.s32 1, %s469_s12   ;;  %s26_s24 = sadd.s32 1, %s465_s11 }
   0xf   : > { %s698_s17 = scalar_select %p529_p8, 1, 0 }
  0x10   : > { %p292_p10 = pneg %p529_p8  ;;  %s23_s22 = ssub.s32 %s469_s12, %s537_s20 }
  0x11   : > { %p547_p12 = scmp.eq.s32.totalorder %s23_s22, 0  ;;  %s341_s27 = scalar_lea.hbm %s691_s1, 128 }
  0x12   : > { %p541_p11 = pnand %p292_p10, %p693_p1  ;;  %p342_p0 = scmp.ne.s32.totalorder %s691_s1, %s341_s27 }
  0x13   : > { %s700_s23 = scalar_select %p547_p12, 1, 0 }
  0x14   : > { %p343_p3 = pneg %p541_p11  ;;  %p348_p10 = scmp.lt.u32.totalorder %s341_s27, %s691_s1 }
  0x16   : > { %p344_p5 = pnand %p343_p3, %p342_p0 }
  0x18   : > { %p345_p7 = pneg %p344_p5 }
  0x1a   : > { %p350_p9 = pnand %p348_p10, %p345_p7 }
  0x1c   : > { %353 = shalt.err (!%p350_p9)
}
  0x1d   : > { %s354_s4 = scalar_lea.vmem %s111_s19, 128  ;;  %p362_p6 = scmp.lt.s32.totalorder %s111_s19, %s111_s19 }
  0x1e   : > { %p355_p1 = scmp.ne.s32.totalorder %s111_s19, %s354_s4  ;;  %p363_p4 = scmp.lt.s32.totalorder %s354_s4, %s354_s4 }
  0x20   : > { %p357_p2 = pnand %p355_p1, %p343_p3  ;;  %p364_p8 = por %p363_p4, %p362_p6 }
  0x22   : > { %p358_p13 = pneg %p357_p2 }
  0x24   : > { %p365_p12 = pnand %p364_p8, %p358_p13 }
  0x26   : > { %368 = shalt.err (!%p365_p12)
}
  0x27   : > { %295 = dma.hbm_to_vmem [thread:$0]  (!%p541_p11), %s691_s1, 128, %s111_s19, [#allocation6]  }
  0x28   : > { %p701_p1 = scmp.ne.s32.totalorder %s700_s23, 0  ;;  %p34_p2 = scmp.eq.s32.totalorder %s469_s12, 0 }
  0x29   : > { %p702_p4 = scmp.ne.s32.totalorder %s465_s11, %s461_s10  ;;  %p703_p6 = scmp.eq.s32.totalorder %s510_s13, 1 }
  0x2a   : > { %s573_s7 = scalar_select %p701_p1, %s465_s11, %s26_s24  }
  0x2b   : > { %p581_p8 = por %p703_p6, %p702_p4  ;;  %p305_p9 = scmp.lt.s32.totalorder %s469_s12, 2 }
  0x2c   : > { %s121_s14 = sand.u32 1, %s465_s11   ;;  %p705_p12 = pmov %p702_p4 }
  0x2d   : > { %s274_s18 = sshll.u32 %s121_s14, 3  ;;  %s275_s21 = sshll.u32 %s469_s12, 7 }
  0x2e   : > { %p35_p13 = por %p34_p2, %p705_p12  ;;  %s594_s19 = scalar_lea.hbm %s690_s0, %s275_s21 }
  0x2f   : > { %s125_s23 = scalar_lea.vmem [#allocation2], %s274_s18  ;;  %s122_s27 = scalar_lea.sflag [#allocation3], %s121_s14 }
  0x30   : > { %s132_s24 = sshll.u32 %s125_s23, 4  ;;  %p596_p11 = pnand %p305_p9, %p35_p13  ;;  %s600_s24 = int_to_ptr.vmem [resolvable:$true] %s132_s24 }
  0x31   : > { %s369_s28 = scalar_lea.hbm %s594_s19, 128  ;;  %s374_s3 = scalar_lea.hbm %s690_s0, 256 }
  0x32   : > { %p370_p0 = scmp.ne.s32.totalorder %s594_s19, %s369_s28  ;;  %p371_p3 = pneg %p596_p11 }
  0x33   : > { %p375_p10 = scmp.lt.u32.totalorder %s594_s19, %s690_s0  ;;  %p376_p1 = scmp.lt.u32.totalorder %s374_s3, %s369_s28 }
  0x34   : > { %p372_p5 = pnand %p371_p3, %p370_p0  ;;  %p378_p4 = scmp.lt.u32.totalorder %s369_s28, %s594_s19 }
  0x35   : > { %p377_p2 = por %p376_p1, %p375_p10 }
  0x36   : > { %p373_p7 = pneg %p372_p5 }
  0x37   : > { %p379_p6 = por %p378_p4, %p377_p2 }
  0x39   : > { %p380_p9 = pnand %p379_p6, %p373_p7 }
  0x3b   : > { %383 = shalt.err (!%p380_p9)
}
  0x3c   : > { %s384_s6 = scalar_lea.vmem %s600_s24, 128  ;;  %s472_s14 = smov [#allocation2]  }
  0x3d   : > { %p385_p12 = scmp.ne.s32.totalorder %s600_s24, %s384_s6  ;;  %s389_s18 = sshll.u32 %s472_s14, 4  ;;  %s390_s18 = int_to_ptr.vmem [resolvable:$false] %s389_s18 }
  0x3e   : > { %s391_s21 = scalar_lea.vmem %s390_s18, 256  ;;  %p392_p5 = scmp.lt.s32.totalorder %s600_s24, %s390_s18 }
  0x3f   : > { %p387_p13 = pnand %p385_p12, %p371_p3  ;;  %p393_p10 = scmp.lt.s32.totalorder %s391_s21, %s384_s6 }
  0x41   : > { %p388_p0 = pneg %p387_p13  ;;  %p394_p1 = por %p393_p10, %p392_p5 }
  0x43   : > { %p395_p2 = pnand %p394_p1, %p388_p0 }
  0x45   : > { %398 = shalt.err (!%p395_p2)
}
  0x46   : > { %299 = dma.hbm_to_vmem [thread:$0]  (!%p596_p11), %s594_s19, 128, %s600_s24, %s122_s27  }
  0x47   : > { %p707_p7 = scmp.ne.s32.totalorder %s698_s17, 0 }
  0x48   : > { %s630_s22 = sand.u32 (!%p707_p7), 1, %s461_s10   ;;  %p708_p3 = scmp.ne.s32.totalorder (!%p707_p7), %s696_s15, 0 }
  0x49   : > { %141 = sbr.rel (%p707_p7) target bundleno = 109 (0x6d), region = 28  ;;  %s277_s25 = sshll.u32 (!%p707_p7), %s630_s22, 3 }
  0x4a   : > { %s144_s23 = scalar_lea.sflag (!%p707_p7), [#allocation3], %s630_s22  ;;  %s147_s28 = scalar_lea.vmem (!%p707_p7), [#allocation2], %s277_s25 }
  0x50   : > { %444 = dma.done.wait (%p708_p3), %s144_s23, 128  }
  0x51   : > { %446 = vsyncadd (%p708_p3), %s144_s23, 4294967168  ;;  %p709_p4 = scmp.eq.s32.totalorder %s510_s13, 0 }
  0x53   : > { %448 = dma.done.wait (%p709_p4), [#allocation6], 128   ;;  %p710_p11 = pmov %p709_p4 }
  0x54   : > { %s171_s17 = scalar_lea.vmem [#allocation7], %s277_s25  ;;  %s281_s24 = sshll.u32 %s510_s13, 7  ;;  %v172_v0 = vld [vmem:[%s147_s28] sm:$0xff]  ;;  %v173_v1 = vld [vmem:[#allocation5] sm:$0xff] }
  0x55   : > { %450 = vsyncadd (%p710_p11), [#allocation6], 4294967168  ;;  %s190_s19 = sshll.u32 %s171_s17, 4  ;;  %v174_v2 = vadd.f32 %v173_v1, %v172_v0  ;;  %s648_s27 = scalar_lea.hbm %s692_s2, %s281_s24  ;;  %s643_s19 = int_to_ptr.vmem [resolvable:$true] %s190_s19 }
  0x56   : > { %s177_s29 = scalar_lea.sflag [#allocation4], %s630_s22  ;;  %s399_s30 = scalar_lea.vmem %s643_s19, 128 }
  0x57   : > { %175 = vst [vmem:[%s171_s17] sm:$0xff] %v174_v2  ;;  %p400_p6 = scmp.ne.s32.totalorder %s643_s19, %s399_s30  ;;  %s473_s13 = smov [#allocation7]  }
  0x58   : > { %s403_s3 = sshll.u32 %s473_s13, 4  ;;  %s404_s3 = int_to_ptr.vmem [resolvable:$false] %s403_s3 }
  0x59   : > { %p401_p9 = pnand %p400_p6, %p581_p8  ;;  %s405_s4 = scalar_lea.vmem %s404_s3, 256 }
  0x5a   : > { %p406_p13 = scmp.lt.s32.totalorder %s643_s19, %s404_s3  ;;  %p407_p0 = scmp.lt.s32.totalorder %s405_s4, %s399_s30 }
  0x5b   : > { %p402_p12 = pneg %p401_p9 }
  0x5c   : > { %p408_p5 = por %p407_p0, %p406_p13 }
  0x5e   : > { %p409_p10 = pnand %p408_p5, %p402_p12 }
  0x60   : > { %412 = shalt.err (!%p409_p10)
}
  0x61   : > { %s413_s5 = scalar_lea.hbm %s648_s27, 128  ;;  %s417_s18 = scalar_lea.hbm %s692_s2, 256 }
  0x62   : > { %p414_p1 = scmp.ne.s32.totalorder %s648_s27, %s413_s5  ;;  %p418_p3 = scmp.lt.u32.totalorder %s648_s27, %s692_s2 }
  0x63   : > { %p419_p4 = scmp.lt.u32.totalorder %s417_s18, %s413_s5  ;;  %p421_p6 = scmp.lt.u32.totalorder %s413_s5, %s648_s27 }
  0x64   : > { %p415_p2 = pnand %p414_p1, %p581_p8 }
  0x65   : > { %p420_p11 = por %p419_p4, %p418_p3 }
  0x66   : > { %p416_p7 = pneg %p415_p2 }
  0x67   : > { %p422_p9 = por %p421_p6, %p420_p11 }
  0x69   : > { %p423_p12 = pnand %p422_p9, %p416_p7 }
  0x6b   : > { %426 = shalt.err (!%p423_p12)
}
  0x6c   : > { %290 = dma.vmem_to_hbm [thread:$0]  (%p581_p8), %s643_s19, 128, %s648_s27, %s177_s29  }
  0x6d PF: > { %s202_s25 = sand.u32 1, %s457_s9   ;;  %p711_p13 = scmp.ne.s32.totalorder %s697_s16, 0 }
  0x6e   : > { %p712_p0 = scmp.ge.s32.totalorder %s469_s12, 2  ;;  %s203_s23 = scalar_lea.sflag [#allocation4], %s202_s25 }
  0x70   : > { %p301_p5 = pnand %p712_p0, %p711_p13 }
  0x72   : > { %452 = dma.done.wait (!%p301_p5), %s203_s23, 128  }
  0x73   : > { %454 = vsyncadd (!%p301_p5), %s203_s23, 4294967168  ;;  %p16_p10 = scmp.ge.s32.totalorder %s537_s20, 4   ;;  %s713_s9 = smov %s461_s10 }
  0x74   : > { %s714_s10 = smov %s465_s11  ;;  %s715_s11 = smov %s573_s7 }
  0x75   : > { %s716_s12 = smov %s537_s20  ;;  %18 = sbr.rel (!%p16_p10) target bundleno = 6 (0x6), region = 77 }
  0x7c   :  { %208 = vsyncpa [#allocation3], 1 }
  0x7d   :  { %210 = vsyncpa [#allocation3 + $0x1], 1 }
  0x7e   :  { %211 = vsyncpa [#allocation6], 1 }
  0x7f   :  { %212 = vsyncpa [#allocation4], 1 }
  0x80   :  { %214 = vsyncpa [#allocation4 + $0x1], 1 }

// kernel: tpu_custom_call.1
= control target key start
LH: loop header
LB: loop body
LE: loop exit
PB: predicated region body
PF: predicated region fallthrough
CT: control target
= control target key end

     0   :  { %s1477_s18 = smov 0   ;;  %s1479_s19 = smov 0   ;;  %s2130_s0 = inlined_call_operand.vmem [shape: f32[4,128,4], index: 0, kind: input, shape index: {}]   ;;  %s2131_s1 = inlined_call_operand.vmem [shape: f32[1,4], index: 1, kind: input, shape index: {}]   ;;  %s2132_s2 = inlined_call_operand.vmem [shape: f32[1,4], index: 2, kind: input, shape index: {}]   ;;  %s2133_s3 = inlined_call_operand.vmem [shape: f32[16,8], index: 3, kind: input, shape index: {}]   ;;  %s2134_s4 = inlined_call_operand.vmem [shape: f32[1,8], index: 4, kind: input, shape index: {}]   ;;  %s2135_s5 = inlined_call_operand.vmem [shape: f32[128,8], index: 5, kind: output, shape index: {}]  }
   0x1   :  { %s1481_s20 = smov 0  }
   0x2 LB: > { %s1248_s21 = sadd.s32 4294967295, %s1442_s20   ;;  %s1494_s22 = sadd.s32 1, %s1442_s20   ;;  %s1442_s20 = sphi %s1481_s20, %s2138_s20   ;;  %s1438_s19 = sphi %s1479_s19, %s2137_s19   ;;  %s1434_s18 = sphi %s1477_s18, %s2136_s18  }
   0x3   : > { %s19_s23 = ssub.s32 %s1442_s20, %s1494_s22  ;;  %s22_s24 = sadd.s32 1, %s1438_s19 }
   0x4   : > { %p20_p0 = scmp.eq.s32.totalorder %s19_s23, 0  ;;  %p29_p1 = scmp.ne.s32.totalorder %s1438_s19, %s1434_s18 }
   0x5   : > { %p30_p2 = scmp.eq.s32.totalorder %s1442_s20, 0  ;;  %p1251_p4 = scmp.ge.s32.totalorder %s1442_s20, 2 }
   0x6   : > { %s1503_s25 = scalar_select %p20_p0, %s1438_s19, %s22_s24  }
   0x7   : > { %p31_p3 = por %p30_p2, %p29_p1  ;;  %177 = sbr.rel (%p1251_p4) target bundleno = 34 (0x22), region = 32 }
   0xe   : > { %180 = sbr.rel (!%p31_p3) target bundleno = 34 (0x22), region = 36  ;;  %s182_s26 = sand.u32 (%p31_p3), 1, %s1438_s19  }
   0xf   : > { %s1296_s27 = sshll.u32 (%p31_p3), %s1442_s20, 6  ;;  %s1252_s28 = sshll.u32 (%p31_p3), %s182_s26, 8 }
  0x10   : > { %s1511_s6 = scalar_lea.vmem (%p31_p3), %s2130_s0, %s1296_s27  ;;  %s1516_s7 = scalar_lea.vmem (%p31_p3), [#allocation2], %s1252_s28 }
  0x11   : > { %v277_v0 = vld [vmem:[%s1511_s6] sm:$0xff] (%p31_p3)  ;;  %v279_v1 = vld [vmem:[%s1511_s6 + $0x8] sm:$0xff] (%p31_p3)  ;;  %v281_v2 = vld [vmem:[%s1511_s6 + $0x10] sm:$0xff] (%p31_p3) }
  0x12   : > { %278 = vst [vmem:[%s1516_s7] sm:$0xff] (%p31_p3), %v277_v0  ;;  %280 = vst [vmem:[%s1516_s7 + $0x8] sm:$0xff] (%p31_p3), %v279_v1  ;;  %v283_v3 = vld [vmem:[%s1511_s6 + $0x18] sm:$0xff] (%p31_p3)  ;;  %v285_v4 = vld [vmem:[%s1511_s6 + $0x20] sm:$0xff] (%p31_p3) }
  0x13   : > { %282 = vst [vmem:[%s1516_s7 + $0x10] sm:$0xff] (%p31_p3), %v281_v2  ;;  %v287_v5 = vld [vmem:[%s1511_s6 + $0x28] sm:$0xff] (%p31_p3)  ;;  %284 = vst [vmem:[%s1516_s7 + $0x18] sm:$0xff] (%p31_p3), %v283_v3  ;;  %v289_v6 = vld [vmem:[%s1511_s6 + $0x30] sm:$0xff] (%p31_p3) }
  0x14   : > { %286 = vst [vmem:[%s1516_s7 + $0x20] sm:$0xff] (%p31_p3), %v285_v4  ;;  %288 = vst [vmem:[%s1516_s7 + $0x28] sm:$0xff] (%p31_p3), %v287_v5  ;;  %v291_v7 = vld [vmem:[%s1511_s6 + $0x38] sm:$0xff] (%p31_p3)  ;;  %v293_v8 = vld [vmem:[%s1511_s6 + $0x80] sm:$0xff] (%p31_p3) }
  0x15   : > { %290 = vst [vmem:[%s1516_s7 + $0x30] sm:$0xff] %v289_v6  ;;  %292 = vst [vmem:[%s1516_s7 + $0x38] sm:$0xff] %v291_v7  ;;  %v295_v9 = vld [vmem:[%s1511_s6 + $0x88] sm:$0xff]  ;;  %v297_v10 = vld [vmem:[%s1511_s6 + $0x90] sm:$0xff] }
  0x16   : > { %294 = vst [vmem:[%s1516_s7 + $0x40] sm:$0xff] %v293_v8  ;;  %v299_v11 = vld [vmem:[%s1511_s6 + $0x98] sm:$0xff]  ;;  %296 = vst [vmem:[%s1516_s7 + $0x48] sm:$0xff] %v295_v9  ;;  %v301_v12 = vld [vmem:[%s1511_s6 + $0xa0] sm:$0xff] }
  0x17   : > { %298 = vst [vmem:[%s1516_s7 + $0x50] sm:$0xff] %v297_v10  ;;  %300 = vst [vmem:[%s1516_s7 + $0x58] sm:$0xff] %v299_v11  ;;  %v303_v13 = vld [vmem:[%s1511_s6 + $0xa8] sm:$0xff]  ;;  %v305_v14 = vld [vmem:[%s1511_s6 + $0xb0] sm:$0xff] }
  0x18   : > { %302 = vst [vmem:[%s1516_s7 + $0x60] sm:$0xff] %v301_v12  ;;  %304 = vst [vmem:[%s1516_s7 + $0x68] sm:$0xff] %v303_v13  ;;  %v307_v15 = vld [vmem:[%s1511_s6 + $0xb8] sm:$0xff]  ;;  %v309_v16 = vld [vmem:[%s1511_s6 + $0x100] sm:$0xff] }
  0x19   : > { %306 = vst [vmem:[%s1516_s7 + $0x70] sm:$0xff] %v305_v14  ;;  %v311_v17 = vld [vmem:[%s1511_s6 + $0x108] sm:$0xff]  ;;  %308 = vst [vmem:[%s1516_s7 + $0x78] sm:$0xff] %v307_v15  ;;  %v313_v18 = vld [vmem:[%s1511_s6 + $0x110] sm:$0xff] }
  0x1a   : > { %310 = vst [vmem:[%s1516_s7 + $0x80] sm:$0xff] %v309_v16  ;;  %312 = vst [vmem:[%s1516_s7 + $0x88] sm:$0xff] %v311_v17  ;;  %v315_v19 = vld [vmem:[%s1511_s6 + $0x118] sm:$0xff]  ;;  %v317_v20 = vld [vmem:[%s1511_s6 + $0x120] sm:$0xff] }
  0x1b   : > { %314 = vst [vmem:[%s1516_s7 + $0x90] sm:$0xff] %v313_v18  ;;  %316 = vst [vmem:[%s1516_s7 + $0x98] sm:$0xff] %v315_v19  ;;  %v319_v21 = vld [vmem:[%s1511_s6 + $0x128] sm:$0xff]  ;;  %v321_v22 = vld [vmem:[%s1511_s6 + $0x130] sm:$0xff] }
  0x1c   : > { %318 = vst [vmem:[%s1516_s7 + $0xa0] sm:$0xff] %v317_v20  ;;  %v323_v23 = vld [vmem:[%s1511_s6 + $0x138] sm:$0xff]  ;;  %320 = vst [vmem:[%s1516_s7 + $0xa8] sm:$0xff] %v319_v21  ;;  %v325_v24 = vld [vmem:[%s1511_s6 + $0x180] sm:$0xff] }
  0x1d   : > { %322 = vst [vmem:[%s1516_s7 + $0xb0] sm:$0xff] %v321_v22  ;;  %324 = vst [vmem:[%s1516_s7 + $0xb8] sm:$0xff] %v323_v23  ;;  %v327_v25 = vld [vmem:[%s1511_s6 + $0x188] sm:$0xff]  ;;  %v329_v26 = vld [vmem:[%s1511_s6 + $0x190] sm:$0xff] }
  0x1e   : > { %326 = vst [vmem:[%s1516_s7 + $0xc0] sm:$0xff] %v325_v24  ;;  %328 = vst [vmem:[%s1516_s7 + $0xc8] sm:$0xff] %v327_v25  ;;  %v331_v27 = vld [vmem:[%s1511_s6 + $0x198] sm:$0xff]  ;;  %v333_v28 = vld [vmem:[%s1511_s6 + $0x1a0] sm:$0xff] }
  0x1f   : > { %330 = vst [vmem:[%s1516_s7 + $0xd0] sm:$0xff] %v329_v26  ;;  %v335_v29 = vld [vmem:[%s1511_s6 + $0x1a8] sm:$0xff]  ;;  %332 = vst [vmem:[%s1516_s7 + $0xd8] sm:$0xff] %v331_v27  ;;  %v337_v30 = vld [vmem:[%s1511_s6 + $0x1b0] sm:$0xff] }
  0x20   : > { %334 = vst [vmem:[%s1516_s7 + $0xe0] sm:$0xff] %v333_v28  ;;  %336 = vst [vmem:[%s1516_s7 + $0xe8] sm:$0xff] %v335_v29  ;;  %v339_v31 = vld [vmem:[%s1511_s6 + $0x1b8] sm:$0xff] }
  0x21   : > { %338 = vst [vmem:[%s1516_s7 + $0xf0] sm:$0xff] %v337_v30  ;;  %340 = vst [vmem:[%s1516_s7 + $0xf8] sm:$0xff] %v339_v31 }
  0x22 PF: > { %p1255_p5 = scmp.ge.s32.totalorder %s1442_s20, 1  ;;  %p345_p6 = scmp.lt.s32.totalorder %s1442_s20, 3 }
  0x24   : > { %p346_p7 = pnand %p1255_p5, %p345_p6 }
  0x25   : > { %s352_s8 = sand.u32 (!%p346_p7), 1, %s1434_s18   ;;  %vm396_vm0 = vcmask (!%p346_p7), 31744   ;;  %s1444_s15 = smov (!%p346_p7), 4   ;;  %vm1021_vm1 = vcmask (!%p346_p7), 64512   ;;  %vm1030_vm2 = vcmask (!%p346_p7), 97280   ;;  %vm1048_vm3 = vcmask (!%p346_p7), 130048  }
  0x26   : > { %349 = sbr.rel (%p346_p7) target bundleno = 738 (0x2e2), region = 74  ;;  %s1256_s9 = sshll.u32 (!%p346_p7), %s352_s8, 8 }
  0x27   : > { %s1582_s10 = scalar_lea.vmem (!%p346_p7), [#allocation2], %s1256_s9  ;;  %s1445_s24 = smov (!%p346_p7), 8  }
  0x28   : > { %v1585_v32 = vld [vmem:[%s1582_s10 + $0x40] sm:$0xff] (!%p346_p7)  ;;  %v1588_v33 = vld [vmem:[%s1582_s10 + $0x48] sm:$0xff] (!%p346_p7)  ;;  %v1645_v56 = vld [vmem:[%s1582_s10 + $0x50] sm:$0xff] (!%p346_p7)  ;;  %s1446_s26 = smov (!%p346_p7), 12   ;;  %s1257_s27 = sshll.u32 (!%p346_p7), %s1248_s21, 3 }
  0x29   : > { %v1591_v34 = vld [vmem:[%s1582_s10 + $0x60] sm:$0xff] (!%p346_p7)  ;;  %v539_v35 = vsel (!%p346_p7), %vm396_vm0, %v1585_v32, 0.0  ;;  %v542_v36 = vsel (!%p346_p7), %vm396_vm0, %v1588_v33, 0.0  ;;  %v1598_v37 = vld [vmem:[%s1582_s10 + $0x68] sm:$0xff] (!%p346_p7)  ;;  %v1648_v57 = vld [vmem:[%s1582_s10 + $0x70] sm:$0xff] (!%p346_p7)  ;;  %v545_v58 = vsel (!%p346_p7), %vm396_vm0, %v1645_v56, 0.0 }
  0x2a   : > { %540 = vadd.xlane.f32.xlu0 (!%p346_p7), %v539_v35  ;;  %543 = vadd.xlane.f32.xlu1 (!%p346_p7), %v542_v36  ;;  %v551_v38 = vsel (!%p346_p7), %vm396_vm0, %v1591_v34, 0.0  ;;  %v554_v39 = vsel (!%p346_p7), %vm396_vm0, %v1598_v37, 0.0  ;;  %v1605_v40 = vld [vmem:[%s1582_s10 + $0x80] sm:$0xff] (!%p346_p7)  ;;  %v1615_v44 = vld [vmem:[%s1582_s10 + $0x88] sm:$0xff] (!%p346_p7)  ;;  %v557_v59 = vsel (!%p346_p7), %vm396_vm0, %v1648_v57, 0.0  ;;  %v1655_v60 = vld [vmem:[%s1582_s10 + $0x58] sm:$0xff] (!%p346_p7) }
  0x2b   : > { %v1608_v41 = vld [vmem:[%s1582_s10 + $0xa0] sm:$0xff] (!%p346_p7)  ;;  %v668_v42 = vsel (!%p346_p7), %vm396_vm0, %v1605_v40, 0.0  ;;  %v1618_v45 = vld [vmem:[%s1582_s10 + $0xa8] sm:$0xff] (!%p346_p7)  ;;  %v671_v46 = vsel (!%p346_p7), %vm396_vm0, %v1615_v44, 0.0  ;;  %v1658_v61 = vld [vmem:[%s1582_s10 + $0x78] sm:$0xff] (!%p346_p7)  ;;  %v548_v62 = vsel (!%p346_p7), %vm396_vm0, %v1655_v60, 0.0 }
  0x2c   : > { %v680_v43 = vsel (!%p346_p7), %vm396_vm0, %v1608_v41, 0.0  ;;  %v683_v47 = vsel (!%p346_p7), %vm396_vm0, %v1618_v45, 0.0  ;;  %v1625_v48 = vld [vmem:[%s1582_s10 + $0xc0] sm:$0xff] (!%p346_p7)  ;;  %v1635_v52 = vld [vmem:[%s1582_s10 + $0xc8] sm:$0xff] (!%p346_p7)  ;;  %v560_v63 = vsel (!%p346_p7), %vm396_vm0, %v1658_v61, 0.0  ;;  %v1665_v0 = vld [vmem:[%s1582_s10 + $0x90] sm:$0xff] (!%p346_p7) }
  0x2d   : > { %v1628_v49 = vld [vmem:[%s1582_s10 + $0xe0] sm:$0xff]  ;;  %v797_v50 = vsel %vm396_vm0, %v1625_v48, 0.0  ;;  %v1638_v53 = vld [vmem:[%s1582_s10 + $0xe8] sm:$0xff]  ;;  %v800_v54 = vsel %vm396_vm0, %v1635_v52, 0.0  ;;  %v1668_v1 = vld [vmem:[%s1582_s10 + $0xb0] sm:$0xff]  ;;  %v674_v2 = vsel %vm396_vm0, %v1665_v0, 0.0 }
  0x2e   : > { %552 = vadd.xlane.f32.xlu0 %v551_v38  ;;  %555 = vadd.xlane.f32.xlu1 %v554_v39  ;;  %v809_v51 = vsel %vm396_vm0, %v1628_v49, 0.0  ;;  %v812_v55 = vsel %vm396_vm0, %v1638_v53, 0.0  ;;  %v686_v3 = vsel %vm396_vm0, %v1668_v1, 0.0  ;;  %v1675_v4 = vld [vmem:[%s1582_s10 + $0x98] sm:$0xff]  ;;  %v1685_v8 = vld [vmem:[%s1582_s10 + $0xd0] sm:$0xff]  ;;  %v1705_v16 = vld [vmem:[%s1582_s10] sm:$0xff] }
  0x2f   : > { %v1678_v5 = vld [vmem:[%s1582_s10 + $0xb8] sm:$0xff]  ;;  %v677_v6 = vsel %vm396_vm0, %v1675_v4, 0.0  ;;  %v1688_v9 = vld [vmem:[%s1582_s10 + $0xf0] sm:$0xff]  ;;  %v803_v10 = vsel %vm396_vm0, %v1685_v8, 0.0  ;;  %v1708_v17 = vld [vmem:[%s1582_s10 + $0x20] sm:$0xff]  ;;  %v397_v18 = vsel %vm396_vm0, %v1705_v16, 0.0 }
  0x30   : > { %v689_v7 = vsel %vm396_vm0, %v1678_v5, 0.0  ;;  %v815_v11 = vsel %vm396_vm0, %v1688_v9, 0.0  ;;  %v1695_v12 = vld [vmem:[%s1582_s10 + $0xd8] sm:$0xff]  ;;  %v409_v19 = vsel %vm396_vm0, %v1708_v17, 0.0  ;;  %v1715_v20 = vld [vmem:[%s1582_s10 + $0x8] sm:$0xff]  ;;  %v1725_v24 = vld [vmem:[%s1582_s10 + $0x10] sm:$0xff] }
  0x31   : > { %v1698_v13 = vld [vmem:[%s1582_s10 + $0xf8] sm:$0xff]  ;;  %v806_v14 = vsel %vm396_vm0, %v1695_v12, 0.0  ;;  %v1718_v21 = vld [vmem:[%s1582_s10 + $0x28] sm:$0xff]  ;;  %v400_v22 = vsel %vm396_vm0, %v1715_v20, 0.0  ;;  %v1728_v25 = vld [vmem:[%s1582_s10 + $0x30] sm:$0xff]  ;;  %v403_v26 = vsel %vm396_vm0, %v1725_v24, 0.0 }
  0x32   : > { %669 = vadd.xlane.f32.xlu0 %v668_v42  ;;  %681 = vadd.xlane.f32.xlu1 %v680_v43  ;;  %v818_v15 = vsel %vm396_vm0, %v1698_v13, 0.0  ;;  %v412_v23 = vsel %vm396_vm0, %v1718_v21, 0.0  ;;  %v415_v27 = vsel %vm396_vm0, %v1728_v25, 0.0  ;;  %v1735_v28 = vld [vmem:[%s1582_s10 + $0x18] sm:$0xff]  ;;  %p381_p8 = scmp.lt.s32.totalorder %s1257_s27, 15 }
  0x33   : > { %v1738_v29 = vld [vmem:[%s1582_s10 + $0x38] sm:$0xff]  ;;  %v406_v30 = vsel %vm396_vm0, %v1735_v28, 0.0 }
  0x34   : > { %v418_v31 = vsel %vm396_vm0, %v1738_v29, 0.0  ;;  %s2140_s27 = smov (!%p381_p8, %s1257_s27), 15 }
  0x35   : > { %s1258_s28 = sshll.u32 %s2140_s27, 3 }
  0x36   : > { %672 = vadd.xlane.f32.xlu0 %v671_v46  ;;  %684 = vadd.xlane.f32.xlu1 %v683_v47  ;;  %s384_s8 = scalar_lea.vmem %s2135_s5, %s1258_s28 }
  0x3a   : > { %798 = vadd.xlane.f32.xlu0 %v797_v50  ;;  %810 = vadd.xlane.f32.xlu1 %v809_v51 }
  0x3e   : > { %801 = vadd.xlane.f32.xlu0 %v800_v54  ;;  %813 = vadd.xlane.f32.xlu1 %v812_v55 }
  0x42   : > { %546 = vadd.xlane.f32.xlu0 %v545_v58  ;;  %558 = vadd.xlane.f32.xlu1 %v557_v59 }
  0x46   : > { %549 = vadd.xlane.f32.xlu0 %v548_v62  ;;  %561 = vadd.xlane.f32.xlu1 %v560_v63 }
  0x4a   : > { %675 = vadd.xlane.f32.xlu0 %v674_v2  ;;  %687 = vadd.xlane.f32.xlu1 %v686_v3 }
  0x4e   : > { %678 = vadd.xlane.f32.xlu0 %v677_v6  ;;  %690 = vadd.xlane.f32.xlu1 %v689_v7 }
  0x52   : > { %804 = vadd.xlane.f32.xlu0 %v803_v10  ;;  %816 = vadd.xlane.f32.xlu1 %v815_v11 }
  0x56   : > { %807 = vadd.xlane.f32.xlu0 %v806_v14  ;;  %819 = vadd.xlane.f32.xlu1 %v818_v15 }
  0x5a   : > { %398 = vadd.xlane.f32.xlu0 %v397_v18  ;;  %410 = vadd.xlane.f32.xlu1 %v409_v19 }
  0x5e   : > { %401 = vadd.xlane.f32.xlu0 %v400_v22  ;;  %413 = vadd.xlane.f32.xlu1 %v412_v23 }
  0x62   : > { %404 = vadd.xlane.f32.xlu0 %v403_v26  ;;  %416 = vadd.xlane.f32.xlu1 %v415_v27 }
  0x66   : > { %407 = vadd.xlane.f32.xlu0 %v406_v30  ;;  %419 = vadd.xlane.f32.xlu1 %v418_v31 }
  0xb7   : > { %v541_v35 = vpop.xlane.xlu0 %540  ;;  %v544_v36 = vpop.xlane.xlu1 %543 }
  0xb8   : > { %v563_v38 = vmul.f32 0.25, %v541_v35  ;;  %v564_v39 = vmul.f32 0.25, %v544_v36 }
  0xba   : > { %v1745_v42 = vsub.f32 %v1585_v32, %v563_v38  ;;  %v1748_v43 = vsub.f32 %v1588_v33, %v564_v39 }
  0xbb   : > { %v553_v46 = vpop.xlane.xlu0 %552  ;;  %v556_v47 = vpop.xlane.xlu1 %555 }
  0xbc   : > { %v567_v50 = vmul.f32 0.25, %v553_v46  ;;  %v568_v51 = vmul.f32 0.25, %v556_v47  ;;  %v579_v54 = vmul.f32 %v1745_v42, %v1745_v42  ;;  %v580_v55 = vmul.f32 %v1748_v43, %v1748_v43 }
  0xbe   : > { %v1755_v58 = vsub.f32 %v1591_v34, %v567_v50  ;;  %v1758_v59 = vsub.f32 %v1598_v37, %v568_v51  ;;  %v587_v32 = vsel %vm396_vm0, %v579_v54, 0.0  ;;  %v590_v63 = vsel %vm396_vm0, %v580_v55, 0.0 }
  0xbf   : > { %v670_v33 = vpop.xlane.xlu0 %669  ;;  %588 = vadd.xlane.f32.xlu0 %v587_v32  ;;  %v682_v62 = vpop.xlane.xlu1 %681 }
  0xc0   : > { %v692_v2 = vmul.f32 0.25, %v670_v33  ;;  %v696_v3 = vmul.f32 0.25, %v682_v62  ;;  %v583_v6 = vmul.f32 %v1755_v58, %v1755_v58  ;;  %v584_v7 = vmul.f32 %v1758_v59, %v1758_v59 }
  0xc2   : > { %v1767_v34 = vsub.f32 %v1605_v40, %v692_v2  ;;  %v1770_v37 = vsub.f32 %v1608_v41, %v696_v3  ;;  %v599_v10 = vsel %vm396_vm0, %v583_v6, 0.0  ;;  %v602_v15 = vsel %vm396_vm0, %v584_v7, 0.0 }
  0xc3   : > { %v673_v11 = vpop.xlane.xlu0 %672  ;;  %600 = vadd.xlane.f32.xlu1 %v599_v10  ;;  %591 = vadd.xlane.f32.xlu0 %v590_v63  ;;  %v685_v14 = vpop.xlane.xlu1 %684 }
  0xc4   : > { %v693_v18 = vmul.f32 0.25, %v673_v11  ;;  %v697_v19 = vmul.f32 0.25, %v685_v14  ;;  %v708_v22 = vmul.f32 %v1767_v34, %v1767_v34  ;;  %v712_v40 = vmul.f32 %v1770_v37, %v1770_v37 }
  0xc6   : > { %v1779_v23 = vsub.f32 %v1615_v44, %v693_v18  ;;  %v1782_v41 = vsub.f32 %v1618_v45, %v697_v19  ;;  %v716_v26 = vsel %vm396_vm0, %v708_v22, 0.0  ;;  %v728_v31 = vsel %vm396_vm0, %v712_v40, 0.0 }
  0xc7   : > { %v799_v27 = vpop.xlane.xlu0 %798  ;;  %603 = vadd.xlane.f32.xlu1 %v602_v15  ;;  %717 = vadd.xlane.f32.xlu0 %v716_v26  ;;  %v811_v30 = vpop.xlane.xlu1 %810 }
  0xc8   : > { %v821_v35 = vmul.f32 0.25, %v799_v27  ;;  %v825_v36 = vmul.f32 0.25, %v811_v30  ;;  %v709_v38 = vmul.f32 %v1779_v23, %v1779_v23  ;;  %v713_v44 = vmul.f32 %v1782_v41, %v1782_v41 }
  0xca   : > { %v1791_v39 = vsub.f32 %v1625_v48, %v821_v35  ;;  %v1794_v45 = vsub.f32 %v1628_v49, %v825_v36  ;;  %v719_v46 = vsel %vm396_vm0, %v709_v38, 0.0  ;;  %v731_v51 = vsel %vm396_vm0, %v713_v44, 0.0 }
  0xcb   : > { %v802_v47 = vpop.xlane.xlu0 %801  ;;  %729 = vadd.xlane.f32.xlu1 %v728_v31  ;;  %720 = vadd.xlane.f32.xlu0 %v719_v46  ;;  %v814_v50 = vpop.xlane.xlu1 %813 }
  0xcc   : > { %v822_v54 = vmul.f32 0.25, %v802_v47  ;;  %v826_v55 = vmul.f32 0.25, %v814_v50  ;;  %v837_v32 = vmul.f32 %v1791_v39, %v1791_v39  ;;  %v841_v48 = vmul.f32 %v1794_v45, %v1794_v45 }
  0xce   : > { %v1803_v33 = vsub.f32 %v1635_v52, %v822_v54  ;;  %v1806_v49 = vsub.f32 %v1638_v53, %v826_v55  ;;  %v845_v62 = vsel %vm396_vm0, %v837_v32, 0.0  ;;  %v857_v3 = vsel %vm396_vm0, %v841_v48, 0.0 }
  0xcf   : > { %v547_v63 = vpop.xlane.xlu0 %546  ;;  %732 = vadd.xlane.f32.xlu1 %v731_v51  ;;  %846 = vadd.xlane.f32.xlu0 %v845_v62  ;;  %v559_v2 = vpop.xlane.xlu1 %558 }
  0xd0   : > { %v565_v6 = vmul.f32 0.25, %v547_v63  ;;  %v569_v7 = vmul.f32 0.25, %v559_v2  ;;  %v838_v10 = vmul.f32 %v1803_v33, %v1803_v33  ;;  %v842_v52 = vmul.f32 %v1806_v49, %v1806_v49 }
  0xd2   : > { %v1815_v11 = vsub.f32 %v1645_v56, %v565_v6  ;;  %v1818_v53 = vsub.f32 %v1648_v57, %v569_v7  ;;  %v848_v14 = vsel %vm396_vm0, %v838_v10, 0.0  ;;  %v860_v19 = vsel %vm396_vm0, %v842_v52, 0.0 }
  0xd3   : > { %v550_v15 = vpop.xlane.xlu0 %549  ;;  %858 = vadd.xlane.f32.xlu1 %v857_v3  ;;  %849 = vadd.xlane.f32.xlu0 %v848_v14  ;;  %v562_v18 = vpop.xlane.xlu1 %561 }
  0xd4   : > { %v566_v22 = vmul.f32 0.25, %v550_v15  ;;  %v570_v40 = vmul.f32 0.25, %v562_v18  ;;  %v581_v26 = vmul.f32 %v1815_v11, %v1815_v11  ;;  %v585_v56 = vmul.f32 %v1818_v53, %v1818_v53 }
  0xd6   : > { %v1827_v27 = vsub.f32 %v1655_v60, %v566_v22  ;;  %v1830_v57 = vsub.f32 %v1658_v61, %v570_v40  ;;  %v593_v30 = vsel %vm396_vm0, %v581_v26, 0.0  ;;  %v605_v36 = vsel %vm396_vm0, %v585_v56, 0.0 }
  0xd7   : > { %v676_v31 = vpop.xlane.xlu0 %675  ;;  %861 = vadd.xlane.f32.xlu1 %v860_v19  ;;  %594 = vadd.xlane.f32.xlu0 %v593_v30  ;;  %v688_v35 = vpop.xlane.xlu1 %687 }
  0xd8   : > { %v694_v38 = vmul.f32 0.25, %v676_v31  ;;  %v698_v44 = vmul.f32 0.25, %v688_v35  ;;  %v582_v46 = vmul.f32 %v1827_v27, %v1827_v27  ;;  %v586_v60 = vmul.f32 %v1830_v57, %v1830_v57 }
  0xda   : > { %v1839_v47 = vsub.f32 %v1665_v0, %v694_v38  ;;  %v1842_v61 = vsub.f32 %v1668_v1, %v698_v44  ;;  %v596_v50 = vsel %vm396_vm0, %v582_v46, 0.0  ;;  %v608_v55 = vsel %vm396_vm0, %v586_v60, 0.0 }
  0xdb   : > { %v679_v51 = vpop.xlane.xlu0 %678  ;;  %606 = vadd.xlane.f32.xlu1 %v605_v36  ;;  %597 = vadd.xlane.f32.xlu0 %v596_v50  ;;  %v691_v54 = vpop.xlane.xlu1 %690 }
  0xdc   : > { %v695_v32 = vmul.f32 0.25, %v679_v51  ;;  %v699_v48 = vmul.f32 0.25, %v691_v54  ;;  %v710_v62 = vmul.f32 %v1839_v47, %v1839_v47  ;;  %v714_v0 = vmul.f32 %v1842_v61, %v1842_v61 }
  0xde   : > { %v1851_v63 = vsub.f32 %v1675_v4, %v695_v32  ;;  %v1854_v1 = vsub.f32 %v1678_v5, %v699_v48  ;;  %v722_v2 = vsel %vm396_vm0, %v710_v62, 0.0  ;;  %v734_v7 = vsel %vm396_vm0, %v714_v0, 0.0 }
  0xdf   : > { %v805_v3 = vpop.xlane.xlu0 %804  ;;  %609 = vadd.xlane.f32.xlu1 %v608_v55  ;;  %723 = vadd.xlane.f32.xlu0 %v722_v2  ;;  %v817_v6 = vpop.xlane.xlu1 %816 }
  0xe0   : > { %v823_v10 = vmul.f32 0.25, %v805_v3  ;;  %v827_v52 = vmul.f32 0.25, %v817_v6  ;;  %v711_v14 = vmul.f32 %v1851_v63, %v1851_v63  ;;  %v715_v4 = vmul.f32 %v1854_v1, %v1854_v1 }
  0xe2   : > { %v1863_v15 = vsub.f32 %v1685_v8, %v823_v10  ;;  %v1866_v5 = vsub.f32 %v1688_v9, %v827_v52  ;;  %v725_v18 = vsel %vm396_vm0, %v711_v14, 0.0  ;;  %v737_v40 = vsel %vm396_vm0, %v715_v4, 0.0 }
  0xe3   : > { %v808_v19 = vpop.xlane.xlu0 %807  ;;  %735 = vadd.xlane.f32.xlu1 %v734_v7  ;;  %726 = vadd.xlane.f32.xlu0 %v725_v18  ;;  %v820_v22 = vpop.xlane.xlu1 %819 }
  0xe4   : > { %v824_v26 = vmul.f32 0.25, %v808_v19  ;;  %v828_v56 = vmul.f32 0.25, %v820_v22  ;;  %v839_v30 = vmul.f32 %v1863_v15, %v1863_v15  ;;  %v843_v8 = vmul.f32 %v1866_v5, %v1866_v5 }
  0xe6   : > { %v1875_v31 = vsub.f32 %v1695_v12, %v824_v26  ;;  %v1878_v9 = vsub.f32 %v1698_v13, %v828_v56  ;;  %v851_v35 = vsel %vm396_vm0, %v839_v30, 0.0  ;;  %v863_v38 = vsel %vm396_vm0, %v843_v8, 0.0 }
  0xe7   : > { %738 = vadd.xlane.f32.xlu1 %v737_v40  ;;  %852 = vadd.xlane.f32.xlu0 %v851_v35  ;;  %v399_v36 = vpop.xlane.xlu0 %398  ;;  %v411_v44 = vpop.xlane.xlu1 %410 }
  0xe8   : > { %v422_v46 = vmul.f32 0.25, %v399_v36  ;;  %v426_v60 = vmul.f32 0.25, %v411_v44  ;;  %v840_v50 = vmul.f32 %v1875_v31, %v1875_v31  ;;  %v844_v12 = vmul.f32 %v1878_v9, %v1878_v9 }
  0xea   : > { %v1887_v51 = vsub.f32 %v1705_v16, %v422_v46  ;;  %v1890_v13 = vsub.f32 %v1708_v17, %v426_v60  ;;  %v854_v54 = vsel %vm396_vm0, %v840_v50, 0.0  ;;  %v866_v32 = vsel %vm396_vm0, %v844_v12, 0.0 }
  0xeb   : > { %864 = vadd.xlane.f32.xlu1 %v863_v38  ;;  %855 = vadd.xlane.f32.xlu0 %v854_v54  ;;  %v402_v55 = vpop.xlane.xlu0 %401  ;;  %v414_v48 = vpop.xlane.xlu1 %413 }
  0xec   : > { %v423_v62 = vmul.f32 0.25, %v402_v55  ;;  %v427_v0 = vmul.f32 0.25, %v414_v48  ;;  %v438_v2 = vmul.f32 %v1887_v51, %v1887_v51  ;;  %v442_v16 = vmul.f32 %v1890_v13, %v1890_v13 }
  0xee   : > { %v1899_v3 = vsub.f32 %v1715_v20, %v423_v62  ;;  %v1902_v17 = vsub.f32 %v1718_v21, %v427_v0  ;;  %v446_v6 = vsel %vm396_vm0, %v438_v2, 0.0  ;;  %v458_v10 = vsel %vm396_vm0, %v442_v16, 0.0 }
  0xef   : > { %867 = vadd.xlane.f32.xlu1 %v866_v32  ;;  %447 = vadd.xlane.f32.xlu0 %v446_v6  ;;  %v405_v7 = vpop.xlane.xlu0 %404  ;;  %v417_v52 = vpop.xlane.xlu1 %416 }
  0xf0   : > { %v424_v14 = vmul.f32 0.25, %v405_v7  ;;  %v428_v4 = vmul.f32 0.25, %v417_v52  ;;  %v439_v18 = vmul.f32 %v1899_v3, %v1899_v3  ;;  %v443_v20 = vmul.f32 %v1902_v17, %v1902_v17 }
  0xf2   : > { %v1911_v19 = vsub.f32 %v1725_v24, %v424_v14  ;;  %v1914_v21 = vsub.f32 %v1728_v25, %v428_v4  ;;  %v449_v22 = vsel %vm396_vm0, %v439_v18, 0.0  ;;  %v461_v26 = vsel %vm396_vm0, %v443_v20, 0.0 }
  0xf3   : > { %459 = vadd.xlane.f32.xlu1 %v458_v10  ;;  %450 = vadd.xlane.f32.xlu0 %v449_v22  ;;  %v408_v40 = vpop.xlane.xlu0 %407  ;;  %v420_v56 = vpop.xlane.xlu1 %419 }
  0xf4   : > { %v425_v30 = vmul.f32 0.25, %v408_v40  ;;  %v429_v8 = vmul.f32 0.25, %v420_v56  ;;  %v440_v35 = vmul.f32 %v1911_v19, %v1911_v19  ;;  %v444_v24 = vmul.f32 %v1914_v21, %v1914_v21 }
  0xf6   : > { %v1923_v36 = vsub.f32 %v1735_v28, %v425_v30  ;;  %v1926_v25 = vsub.f32 %v1738_v29, %v429_v8  ;;  %v452_v38 = vsel %vm396_vm0, %v440_v35, 0.0  ;;  %v464_v44 = vsel %vm396_vm0, %v444_v24, 0.0  ;;  %v1939_v30 = vld [vmem:[%s2131_s1] ss:$0 sm:$0xff] }
  0xf7   : > { %462 = vadd.xlane.f32.xlu1 %v461_v26  ;;  %453 = vadd.xlane.f32.xlu0 %v452_v38 }
  0xf8   : > { %v441_v46 = vmul.f32 %v1923_v36, %v1923_v36  ;;  %v445_v60 = vmul.f32 %v1926_v25, %v1926_v25 }
  0xfa   : > { %v455_v50 = vsel %vm396_vm0, %v441_v46, 0.0  ;;  %v467_v28 = vsel %vm396_vm0, %v445_v60, 0.0  ;;  %v1945_v46 = vld [vmem:[%s2132_s2] ss:$0 sm:$0xff] }
  0xfb   : > { %465 = vadd.xlane.f32.xlu1 %v464_v44  ;;  %456 = vadd.xlane.f32.xlu0 %v455_v50 }
  0xff   : > { %468 = vadd.xlane.f32.xlu1 %v467_v28 }
 0x14c   : > { %v589_v29 = vpop.xlane.xlu0 %588 }
 0x14d   : > { %v611_v12 = vmul.f32 0.25, %v589_v29 }
 0x14f   : > { %v619_v54 = vadd.f32 1e-06, %v611_v12 }
 0x150   : > { %v601_v55 = vpop.xlane.xlu1 %600  ;;  %v592_v32 = vpop.xlane.xlu0 %591 }
 0x151   : > { %1356 = vrsqrt.f32 %v619_v54  ;;  %v615_v48 = vmul.f32 0.25, %v601_v55  ;;  %v612_v62 = vmul.f32 0.25, %v592_v32 }
 0x153   : > { %v623_v0 = vadd.f32 1e-06, %v615_v48  ;;  %v620_v2 = vadd.f32 1e-06, %v612_v62 }
 0x154   : > { %v604_v16 = vpop.xlane.xlu1 %603  ;;  %v718_v6 = vpop.xlane.xlu0 %717 }
 0x155   : > { %1358 = vrsqrt.f32 %v623_v0  ;;  %v616_v7 = vmul.f32 0.25, %v604_v16  ;;  %v740_v10 = vmul.f32 0.25, %v718_v6 }
 0x156   : > { %1360 = vrsqrt.f32 %v620_v2 }
 0x157   : > { %v624_v52 = vadd.f32 1e-06, %v616_v7  ;;  %v748_v14 = vadd.f32 1e-06, %v740_v10 }
 0x158   : > { %v730_v4 = vpop.xlane.xlu1 %729  ;;  %v721_v18 = vpop.xlane.xlu0 %720 }
 0x159   : > { %1362 = vrsqrt.f32 %v624_v52  ;;  %v744_v20 = vmul.f32 0.25, %v730_v4  ;;  %v741_v22 = vmul.f32 0.25, %v721_v18 }
 0x15a   : > { %1364 = vrsqrt.f32 %v748_v14 }
 0x15b   : > { %v1357_v40 = vpop.eup %1356  ;;  %v752_v26 = vadd.f32 1e-06, %v744_v20  ;;  %v749_v56 = vadd.f32 1e-06, %v741_v22  ;;  %v1039_v22 = vld [vmem:[%s2133_s3] sm:$0xff] }
 0x15c   : > { %v733_v8 = vpop.xlane.xlu1 %732  ;;  %v847_v35 = vpop.xlane.xlu0 %846  ;;  %v635_v24 = vmul.f32 %v1357_v40, %v1745_v42  ;;  %v1040_v40 = vld [vmem:[%s2133_s3 + $0x8] sm:$0xff] }
 0x15d   : > { %1366 = vrsqrt.f32 %v752_v26  ;;  %v745_v38 = vmul.f32 0.25, %v733_v8  ;;  %v869_v44 = vmul.f32 0.25, %v847_v35 }
 0x15e   : > { %1368 = vrsqrt.f32 %v749_v56  ;;  %v643_v60 = vmul.f32 %v1939_v30, %v635_v24  ;;  %v1323_v56 = vpack.c.bf16 %v1040_v40, %v1039_v22 }
 0x15f   : > { %v1359_v50 = vpop.eup %1358  ;;  %v753_v28 = vadd.f32 1e-06, %v745_v38  ;;  %v877_v29 = vadd.f32 1e-06, %v869_v44 }
 0x160   : > { %v1361_v12 = vpop.eup %1360  ;;  %v859_v54 = vpop.xlane.xlu1 %858  ;;  %v651_v32 = vadd.f32 %v1945_v46, %v643_v60  ;;  %v639_v42 = vmul.f32 %v1359_v50, %v1755_v58  ;;  %1324 = vmatprep.subr.bf16.mxu0 %v1323_v56  ;;  %1327 = vmatprep.subr.bf16.mxu1 %v1323_v56 }
 0x161   : > { %v850_v55 = vpop.xlane.xlu0 %849  ;;  %1370 = vrsqrt.f32 %v753_v28  ;;  %v873_v48 = vmul.f32 0.25, %v859_v54  ;;  %v636_v0 = vmul.f32 %v1361_v12, %v1748_v43  ;;  %1326 = vmatpush3.bf16.msra.mxu0 %v1323_v56  ;;  %1328 = vmatpush3.bf16.msra.mxu1 %v1323_v56 }
 0x162   : > { %v870_v62 = vmul.f32 0.25, %v850_v55  ;;  %1372 = vrsqrt.f32 %v877_v29  ;;  %925 = vrot.lane.b32.xlu0 %v651_v32, %s1444_s15  ;;  %v647_v2 = vmul.f32 %v1939_v30, %v639_v42 }
 0x163   : > { %v1363_v16 = vpop.eup %1362  ;;  %v881_v6 = vadd.f32 1e-06, %v873_v48  ;;  %v644_v10 = vmul.f32 %v1939_v30, %v636_v0 }
 0x164   : > { %v878_v7 = vadd.f32 1e-06, %v870_v62  ;;  %v1365_v52 = vpop.eup %1364  ;;  %v862_v14 = vpop.xlane.xlu1 %861  ;;  %v655_v58 = vadd.f32 %v1945_v46, %v647_v2  ;;  %v640_v18 = vmul.f32 %v1363_v16, %v1758_v59 }
 0x165   : > { %v595_v4 = vpop.xlane.xlu0 %594  ;;  %1374 = vrsqrt.f32 %v881_v6  ;;  %v874_v43 = vmul.f32 0.25, %v862_v14  ;;  %v764_v26 = vmul.f32 %v1365_v52, %v1767_v34  ;;  %v652_v24 = vadd.f32 %v1945_v46, %v644_v10 }
 0x166   : > { %v613_v20 = vmul.f32 0.25, %v595_v4  ;;  %1376 = vrsqrt.f32 %v878_v7  ;;  %933 = vrot.lane.b32.xlu1 %v655_v58, %s1444_s15  ;;  %v648_v28 = vmul.f32 %v1939_v30, %v640_v18 }
 0x167   : > { %v1367_v8 = vpop.eup %1366  ;;  %v882_v35 = vadd.f32 1e-06, %v874_v43  ;;  %v772_v50 = vmul.f32 %v1939_v30, %v764_v26 }
 0x168   : > { %v621_v59 = vadd.f32 1e-06, %v613_v20  ;;  %v1369_v38 = vpop.eup %1368  ;;  %v607_v44 = vpop.xlane.xlu1 %606  ;;  %v768_v29 = vmul.f32 %v1367_v8, %v1770_v37 }
 0x169   : > { %v598_v60 = vpop.xlane.xlu0 %597  ;;  %1378 = vrsqrt.f32 %v882_v35  ;;  %v617_v12 = vmul.f32 0.25, %v607_v44  ;;  %v765_v54 = vmul.f32 %v1369_v38, %v1779_v23  ;;  %v780_v55 = vadd.f32 %v1945_v46, %v772_v50 }
 0x16a   : > { %v614_v34 = vmul.f32 0.25, %v598_v60  ;;  %1380 = vrsqrt.f32 %v621_v59  ;;  %927 = vrot.lane.b32.xlu1 %v652_v24, %s1444_s15  ;;  %v656_v23 = vadd.f32 %v1945_v46, %v648_v28  ;;  %v776_v16 = vmul.f32 %v1939_v30, %v768_v29 }
 0x16b   : > { %v1371_v32 = vpop.eup %1370  ;;  %v625_v42 = vadd.f32 1e-06, %v617_v12  ;;  %v773_v62 = vmul.f32 %v1939_v30, %v765_v54  ;;  %957 = vrot.lane.b32.xlu0 %v780_v55, %s1445_s24 }
 0x16c   : > { %v622_v48 = vadd.f32 1e-06, %v614_v34  ;;  %v1373_v37 = vpop.eup %1372  ;;  %v610_v0 = vpop.xlane.xlu1 %609  ;;  %v769_v6 = vmul.f32 %v1371_v32, %v1782_v41  ;;  %v784_v41 = vadd.f32 %v1945_v46, %v776_v16 }
 0x16d   : > { %v724_v2 = vpop.xlane.xlu0 %723  ;;  %1382 = vrsqrt.f32 %v625_v42  ;;  %v618_v7 = vmul.f32 0.25, %v610_v0  ;;  %v781_v52 = vadd.f32 %v1945_v46, %v773_v62  ;;  %v893_v14 = vmul.f32 %v1373_v37, %v1791_v39 }
 0x16e   : > { %v742_v10 = vmul.f32 0.25, %v724_v2  ;;  %1384 = vrsqrt.f32 %v622_v48  ;;  %935 = vrot.lane.b32.xlu1 %v656_v23, %s1444_s15  ;;  %v777_v26 = vmul.f32 %v1939_v30, %v769_v6 }
 0x16f   : > { %v1375_v4 = vpop.eup %1374  ;;  %v626_v58 = vadd.f32 1e-06, %v618_v7  ;;  %959 = vrot.lane.b32.xlu0 %v781_v52, %s1445_s24  ;;  %v901_v40 = vmul.f32 %v1939_v30, %v893_v14 }
 0x170   : > { %v750_v18 = vadd.f32 1e-06, %v742_v10  ;;  %v1377_v43 = vpop.eup %1376  ;;  %v736_v20 = vpop.xlane.xlu1 %735  ;;  %v897_v56 = vmul.f32 %v1375_v4, %v1794_v45  ;;  %v785_v29 = vadd.f32 %v1945_v46, %v777_v26 }
 0x171   : > { %v727_v22 = vpop.xlane.xlu0 %726  ;;  %1386 = vrsqrt.f32 %v626_v58  ;;  %v746_v8 = vmul.f32 0.25, %v736_v20  ;;  %v894_v39 = vmul.f32 %v1377_v43, %v1803_v33  ;;  %v909_v59 = vadd.f32 %v1945_v46, %v901_v40 }
 0x172   : > { %v743_v35 = vmul.f32 0.25, %v727_v22  ;;  %1388 = vrsqrt.f32 %v750_v18  ;;  %965 = vrot.lane.b32.xlu1 %v784_v41, %s1445_s24  ;;  %v905_v33 = vmul.f32 %v1939_v30, %v897_v56 }
 0x173   : > { %v1379_v24 = vpop.eup %1378  ;;  %v754_v38 = vadd.f32 1e-06, %v746_v8  ;;  %v902_v60 = vmul.f32 %v1939_v30, %v894_v39  ;;  %989 = vrot.lane.b32.xlu0 %v909_v59, %s1446_s26 }
 0x174   : > { %v751_v44 = vadd.f32 1e-06, %v743_v35  ;;  %v1381_v50 = vpop.eup %1380  ;;  %v739_v45 = vpop.xlane.xlu1 %738  ;;  %v898_v12 = vmul.f32 %v1379_v24, %v1806_v49  ;;  %v913_v49 = vadd.f32 %v1945_v46, %v905_v33 }
 0x175   : > { %v853_v28 = vpop.xlane.xlu0 %852  ;;  %1390 = vrsqrt.f32 %v754_v38  ;;  %v747_v34 = vmul.f32 0.25, %v739_v45  ;;  %v910_v55 = vadd.f32 %v1945_v46, %v902_v60  ;;  %v637_v32 = vmul.f32 %v1381_v50, %v1815_v11 }
 0x176   : > { %v871_v54 = vmul.f32 0.25, %v853_v28  ;;  %1392 = vrsqrt.f32 %v751_v44  ;;  %967 = vrot.lane.b32.xlu1 %v785_v29, %s1445_s24  ;;  %v906_v16 = vmul.f32 %v1939_v30, %v898_v12 }
 0x177   : > { %v1383_v42 = vpop.eup %1382  ;;  %v755_v48 = vadd.f32 1e-06, %v747_v34  ;;  %991 = vrot.lane.b32.xlu0 %v910_v55, %s1446_s26  ;;  %v645_v23 = vmul.f32 %v1939_v30, %v637_v32 }
 0x178   : > { %v879_v62 = vadd.f32 1e-06, %v871_v54  ;;  %v1385_v37 = vpop.eup %1384  ;;  %v865_v0 = vpop.xlane.xlu1 %864  ;;  %v641_v6 = vmul.f32 %v1383_v42, %v1818_v53  ;;  %v914_v22 = vadd.f32 %v1945_v46, %v906_v16 }
 0x179   : > { %v856_v2 = vpop.xlane.xlu0 %855  ;;  %1394 = vrsqrt.f32 %v755_v48  ;;  %v875_v7 = vmul.f32 0.25, %v865_v0  ;;  %v638_v11 = vmul.f32 %v1385_v37, %v1827_v27  ;;  %v653_v52 = vadd.f32 %v1945_v46, %v645_v23 }
 0x17a   : > { %v872_v10 = vmul.f32 0.25, %v856_v2  ;;  %1396 = vrsqrt.f32 %v879_v62  ;;  %997 = vrot.lane.b32.xlu1 %v913_v49, %s1446_s26  ;;  %v649_v41 = vmul.f32 %v1939_v30, %v641_v6 }
 0x17b   : > { %v1387_v14 = vpop.eup %1386  ;;  %v883_v4 = vadd.f32 1e-06, %v875_v7  ;;  %v646_v18 = vmul.f32 %v1939_v30, %v638_v11  ;;  %929 = vrot.lane.b32.xlu0 %v653_v52, %s1444_s15 }
 0x17c   : > { %v880_v58 = vadd.f32 1e-06, %v872_v10  ;;  %v1389_v43 = vpop.eup %1388  ;;  %v868_v20 = vpop.xlane.xlu1 %867  ;;  %v642_v27 = vmul.f32 %v1387_v14, %v1830_v57  ;;  %v657_v57 = vadd.f32 %v1945_v46, %v649_v41 }
 0x17d   : > { %v448_v53 = vpop.xlane.xlu0 %447  ;;  %1398 = vrsqrt.f32 %v883_v4  ;;  %v876_v40 = vmul.f32 0.25, %v868_v20  ;;  %v654_v56 = vadd.f32 %v1945_v46, %v646_v18  ;;  %v766_v8 = vmul.f32 %v1389_v43, %v1839_v47 }
 0x17e   : > { %v470_v26 = vmul.f32 0.25, %v448_v53  ;;  %1400 = vrsqrt.f32 %v880_v58  ;;  %999 = vrot.lane.b32.xlu1 %v914_v22, %s1446_s26  ;;  %v650_v50 = vmul.f32 %v1939_v30, %v642_v27 }
 0x17f   : > { %v1391_v35 = vpop.eup %1390  ;;  %v884_v39 = vadd.f32 1e-06, %v876_v40  ;;  %931 = vrot.lane.b32.xlu0 %v654_v56, %s1444_s15  ;;  %v774_v60 = vmul.f32 %v1939_v30, %v766_v8 }
 0x180   : > { %v478_v59 = vadd.f32 1e-06, %v470_v26  ;;  %v1393_v24 = vpop.eup %1392  ;;  %v460_v38 = vpop.xlane.xlu1 %459  ;;  %v770_v45 = vmul.f32 %v1391_v35, %v1842_v61  ;;  %v658_v48 = vadd.f32 %v1945_v46, %v650_v50 }
 0x181   : > { %v451_v44 = vpop.xlane.xlu0 %450  ;;  %1402 = vrsqrt.f32 %v884_v39  ;;  %v474_v28 = vmul.f32 0.25, %v460_v38  ;;  %v767_v47 = vmul.f32 %v1393_v24, %v1851_v63  ;;  %v782_v33 = vadd.f32 %v1945_v46, %v774_v60 }
 0x182   : > { %v471_v29 = vmul.f32 0.25, %v451_v44  ;;  %1404 = vrsqrt.f32 %v478_v59  ;;  %937 = vrot.lane.b32.xlu1 %v657_v57, %s1444_s15  ;;  %v778_v62 = vmul.f32 %v1939_v30, %v770_v45 }
 0x183   : > { %v1395_v12 = vpop.eup %1394  ;;  %v482_v34 = vadd.f32 1e-06, %v474_v28  ;;  %v775_v55 = vmul.f32 %v1939_v30, %v767_v47  ;;  %961 = vrot.lane.b32.xlu0 %v782_v33, %s1445_s24 }
 0x184   : > { %v479_v54 = vadd.f32 1e-06, %v471_v29  ;;  %v1397_v32 = vpop.eup %1396  ;;  %v463_v42 = vpop.xlane.xlu1 %462  ;;  %v771_v63 = vmul.f32 %v1395_v12, %v1854_v1  ;;  %v786_v1 = vadd.f32 %v1945_v46, %v778_v62 }
 0x185   : > { %v454_v61 = vpop.xlane.xlu0 %453  ;;  %1406 = vrsqrt.f32 %v482_v34  ;;  %v475_v37 = vmul.f32 0.25, %v463_v42  ;;  %v783_v2 = vadd.f32 %v1945_v46, %v775_v55  ;;  %v895_v49 = vmul.f32 %v1397_v32, %v1863_v15 }
 0x186   : > { %v472_v0 = vmul.f32 0.25, %v454_v61  ;;  %1408 = vrsqrt.f32 %v479_v54  ;;  %939 = vrot.lane.b32.xlu1 %v658_v48, %s1444_s15  ;;  %v779_v14 = vmul.f32 %v1939_v30, %v771_v63 }
 0x187   : > { %v1399_v23 = vpop.eup %1398  ;;  %v483_v16 = vadd.f32 1e-06, %v475_v37  ;;  %963 = vrot.lane.b32.xlu0 %v783_v2, %s1445_s24  ;;  %v903_v52 = vmul.f32 %v1939_v30, %v895_v49 }
 0x188   : > { %v480_v6 = vadd.f32 1e-06, %v472_v0  ;;  %v1401_v7 = vpop.eup %1400  ;;  %v466_v10 = vpop.xlane.xlu1 %465  ;;  %v899_v4 = vmul.f32 %v1399_v23, %v1866_v5  ;;  %v787_v5 = vadd.f32 %v1945_v46, %v779_v14 }
 0x189   : > { %v457_v11 = vpop.xlane.xlu0 %456  ;;  %1410 = vrsqrt.f32 %v483_v16  ;;  %v476_v58 = vmul.f32 0.25, %v466_v10  ;;  %v896_v15 = vmul.f32 %v1401_v7, %v1875_v31  ;;  %v911_v43 = vadd.f32 %v1945_v46, %v903_v52 }
 0x18a   : > { %v473_v18 = vmul.f32 0.25, %v457_v11  ;;  %1412 = vrsqrt.f32 %v480_v6  ;;  %969 = vrot.lane.b32.xlu1 %v786_v1, %s1445_s24  ;;  %v907_v26 = vmul.f32 %v1939_v30, %v899_v4 }
 0x18b   : > { %v1403_v20 = vpop.eup %1402  ;;  %v484_v53 = vadd.f32 1e-06, %v476_v58  ;;  %v904_v41 = vmul.f32 %v1939_v30, %v896_v15  ;;  %993 = vrot.lane.b32.xlu0 %v911_v43, %s1446_s26 }
 0x18c   : > { %v481_v22 = vadd.f32 1e-06, %v473_v18  ;;  %v1405_v27 = vpop.eup %1404  ;;  %v469_v40 = vpop.xlane.xlu1 %468  ;;  %v900_v31 = vmul.f32 %v1403_v20, %v1878_v9  ;;  %v915_v44 = vadd.f32 %v1945_v46, %v907_v26 }
 0x18d   : > { %1414 = vrsqrt.f32 %v484_v53  ;;  %v477_v56 = vmul.f32 0.25, %v469_v40  ;;  %v912_v8 = vadd.f32 %v1945_v46, %v904_v41  ;;  %v494_v35 = vmul.f32 %v1405_v27, %v1887_v51 }
 0x18e   : > { %1416 = vrsqrt.f32 %v481_v22  ;;  %971 = vrot.lane.b32.xlu1 %v787_v5, %s1445_s24  ;;  %v908_v9 = vmul.f32 %v1939_v30, %v900_v31 }
 0x18f   : > { %v1407_v39 = vpop.eup %1406  ;;  %v485_v59 = vadd.f32 1e-06, %v477_v56  ;;  %v508_v24 = vmul.f32 %v1939_v30, %v494_v35  ;;  %995 = vrot.lane.b32.xlu0 %v912_v8, %s1446_s26 }
 0x190   : > { %v1409_v38 = vpop.eup %1408  ;;  %v498_v57 = vmul.f32 %v1407_v39, %v1890_v13  ;;  %v916_v47 = vadd.f32 %v1945_v46, %v908_v9 }
 0x191   : > { %1418 = vrsqrt.f32 %v485_v59  ;;  %v522_v60 = vadd.f32 %v1945_v46, %v508_v24  ;;  %v495_v51 = vmul.f32 %v1409_v38, %v1899_v3 }
 0x192   : > { %1001 = vrot.lane.b32.xlu1 %v915_v44, %s1446_s26  ;;  %v512_v50 = vmul.f32 %v1939_v30, %v498_v57 }
 0x193   : > { %v1411_v45 = vpop.eup %1410  ;;  %v509_v28 = vmul.f32 %v1939_v30, %v495_v51 }
 0x194   : > { %v1413_v29 = vpop.eup %1412  ;;  %v526_v33 = vadd.f32 %v1945_v46, %v512_v50  ;;  %v499_v12 = vmul.f32 %v1411_v45, %v1902_v17 }
 0x195   : > { %v523_v13 = vadd.f32 %v1945_v46, %v509_v28  ;;  %v496_v34 = vmul.f32 %v1413_v29, %v1911_v19 }
 0x196   : > { %1003 = vrot.lane.b32.xlu1 %v916_v47, %s1446_s26  ;;  %v513_v3 = vmul.f32 %v1939_v30, %v499_v12 }
 0x197   : > { %v1415_v54 = vpop.eup %1414  ;;  %v510_v55 = vmul.f32 %v1939_v30, %v496_v34 }
 0x198   : > { %v1417_v32 = vpop.eup %1416  ;;  %v527_v42 = vadd.f32 %v1945_v46, %v513_v3  ;;  %v500_v61 = vmul.f32 %v1415_v54, %v1914_v21  ;;  %v1285_v3 = vld [vmem:[%s2134_s4] ss:$0 sm:$0xff] }
 0x199   : > { %v524_v48 = vadd.f32 %v1945_v46, %v510_v55  ;;  %v497_v17 = vmul.f32 %v1417_v32, %v1923_v36 }
 0x19a   : > { %v514_v62 = vmul.f32 %v1939_v30, %v500_v61 }
 0x19b   : > { %v1419_v63 = vpop.eup %1418  ;;  %v511_v19 = vmul.f32 %v1939_v30, %v497_v17 }
 0x19c   : > { %v528_v37 = vadd.f32 %v1945_v46, %v514_v62  ;;  %v501_v0 = vmul.f32 %v1419_v63, %v1926_v25 }
 0x19d   : > { %v525_v2 = vadd.f32 %v1945_v46, %v511_v19 }
 0x19e   : > { %v515_v49 = vmul.f32 %v1939_v30, %v501_v0 }
 0x1a0   : > { %v529_v23 = vadd.f32 %v1945_v46, %v515_v49 }
 0x1d4   : > { %v926_v16 = vpop.permute.xlu0 %925 }
 0x1d5   : > { %v1013_v1 = vsel %vm396_vm0, %v522_v60, %v926_v16 }
 0x1d8   : > { %v934_v21 = vpop.permute.xlu1 %933 }
 0x1d9   : > { %v1017_v18 = vsel %vm396_vm0, %v526_v33, %v934_v21 }
 0x1dc   : > { %v928_v6 = vpop.permute.xlu1 %927 }
 0x1dd   : > { %v958_v7 = vpop.permute.xlu0 %957  ;;  %v1014_v46 = vsel %vm396_vm0, %v523_v13, %v928_v6 }
 0x1de   : > { %v1022_v25 = vsel %vm1021_vm1, %v1013_v1, %v958_v7 }
 0x1e0   : > { %v936_v36 = vpop.permute.xlu1 %935 }
 0x1e1   : > { %v960_v10 = vpop.permute.xlu0 %959  ;;  %v1018_v41 = vsel %vm396_vm0, %v527_v42, %v936_v36 }
 0x1e2   : > { %v1023_v4 = vsel %vm1021_vm1, %v1014_v46, %v960_v10 }
 0x1e4   : > { %v966_v11 = vpop.permute.xlu1 %965 }
 0x1e5   : > { %v990_v52 = vpop.permute.xlu0 %989  ;;  %v1026_v43 = vsel %vm1021_vm1, %v1017_v18, %v966_v11 }
 0x1e6   : > { %v1031_v14 = vsel %vm1030_vm2, %v1022_v25, %v990_v52 }
 0x1e7   : > { %1311 = vmatprep.mubr.msk.f32.mxu0 %vm1048_vm3, %v1031_v14 }
 0x1e8   : > { %v968_v30 = vpop.permute.xlu1 %967 }
 0x1e9   : > { %v992_v58 = vpop.permute.xlu0 %991  ;;  %v1027_v27 = vsel %vm1021_vm1, %v1018_v41, %v968_v30 }
 0x1ea   : > { %v1032_v15 = vsel %vm1030_vm2, %v1023_v4, %v992_v58 }
 0x1eb   : > { %1312 = vmatmul.mubr.msk.f32.vlgmr.msra.gmra.mrb[0].mxu0 %vm1048_vm3, %v1032_v15 }
 0x1ec   : > { %v998_v20 = vpop.permute.xlu1 %997 }
 0x1ed   : > { %v1035_v53 = vsel %vm1030_vm2, %v1026_v43, %v998_v20  ;;  %v930_v22 = vpop.permute.xlu0 %929 }
 0x1ee   : > { %1317 = vmatprep.mubr.msk.f32.mxu1 %vm1048_vm3, %v1035_v53  ;;  %v1015_v59 = vsel %vm396_vm0, %v524_v48, %v930_v22 }
 0x1f0   : > { %v1000_v40 = vpop.permute.xlu1 %999 }
 0x1f1   : > { %v1036_v5 = vsel %vm1030_vm2, %v1027_v27, %v1000_v40  ;;  %v932_v26 = vpop.permute.xlu0 %931 }
 0x1f2   : > { %1318 = vmatmul.mubr.msk.f32.vlgmr.msra.gmra.mrb[0].mxu1 %vm1048_vm3, %v1036_v5  ;;  %v1016_v57 = vsel %vm396_vm0, %v525_v2, %v932_v26 }
 0x1f4   : > { %v938_v31 = vpop.permute.xlu1 %937 }
 0x1f5   : > { %v962_v56 = vpop.permute.xlu0 %961  ;;  %v1019_v50 = vsel %vm396_vm0, %v528_v37, %v938_v31 }
 0x1f6   : > { %v1024_v24 = vsel %vm1021_vm1, %v1015_v59, %v962_v56 }
 0x1f8   : > { %v940_v8 = vpop.permute.xlu1 %939 }
 0x1f9   : > { %v964_v35 = vpop.permute.xlu0 %963  ;;  %v1020_v33 = vsel %vm396_vm0, %v529_v23, %v940_v8 }
 0x1fa   : > { %v1025_v60 = vsel %vm1021_vm1, %v1016_v57, %v964_v35 }
 0x1fc   : > { %v970_v39 = vpop.permute.xlu1 %969 }
 0x1fd   : > { %v994_v38 = vpop.permute.xlu0 %993  ;;  %v1028_v28 = vsel %vm1021_vm1, %v1019_v50, %v970_v39 }
 0x1fe   : > { %v1033_v44 = vsel %vm1030_vm2, %v1024_v24, %v994_v38 }
 0x1ff   : > { %1314 = vmatprep.mubr.msk.f32.mxu0 %vm1048_vm3, %v1033_v44 }
 0x200   : > { %v972_v9 = vpop.permute.xlu1 %971 }
 0x201   : > { %v996_v51 = vpop.permute.xlu0 %995  ;;  %v1029_v12 = vsel %vm1021_vm1, %v1020_v33, %v972_v9 }
 0x202   : > { %v1034_v45 = vsel %vm1030_vm2, %v1025_v60, %v996_v51 }
 0x203   : > { %1315 = vmatmul.mubr.msk.f32.gmra.mrb[2].mxu0 %vm1048_vm3, %v1034_v45 }
 0x204   : > { %v1002_v29 = vpop.permute.xlu1 %1001 }
 0x205   : > { %v1037_v47 = vsel %vm1030_vm2, %v1028_v28, %v1002_v29 }
 0x206   : > { %1320 = vmatprep.mubr.msk.f32.mxu1 %vm1048_vm3, %v1037_v47 }
 0x208   : > { %v1004_v13 = vpop.permute.xlu1 %1003 }
 0x209   : > { %v1038_v34 = vsel %vm1030_vm2, %v1029_v12, %v1004_v13 }
 0x20a   : > { %1321 = vmatmul.mubr.msk.f32.gmra.mrb[2].mxu1 %vm1048_vm3, %v1038_v34 }
 0x2be   : > { %v1313_v54 = vpop.f32.mrb[0].mxu0 }
 0x2bf   : > { %v1145_v55 = vadd.f32 %v1313_v54, %v1285_v3  ;;  %v1139_v32 = vpop.f32.mrb[1].mxu0 }
 0x2c0   : > { %v1140_v42 = vadd.f32 %v1285_v3, %v1139_v32 }
 0x2c1   : > { %1179 = vst.msk [vmem:[%s384_s8 + $0x8] sm:$0xff] %vm1021_vm1, %v1145_v55 }
 0x2c2   : > { %1178 = vst.msk [vmem:[%s384_s8] sm:$0xff] %vm1021_vm1, %v1140_v42 }
 0x2c5   : > { %v1319_v61 = vpop.f32.mrb[0].mxu1 }
 0x2c6   : > { %v1165_v48 = vadd.f32 %v1319_v61, %v1285_v3  ;;  %v1159_v17 = vpop.f32.mrb[1].mxu1 }
 0x2c7   : > { %v1160_v62 = vadd.f32 %v1285_v3, %v1159_v17 }
 0x2c8   : > { %1183 = vst.msk [vmem:[%s384_s8 + $0x28] sm:$0xff] %vm1021_vm1, %v1165_v48 }
 0x2c9   : > { %1182 = vst.msk [vmem:[%s384_s8 + $0x20] sm:$0xff] %vm1021_vm1, %v1160_v62 }
 0x2d6   : > { %v1316_v63 = vpop.f32.mrb[2].mxu0 }
 0x2d7   : > { %v1155_v19 = vadd.f32 %v1316_v63, %v1285_v3  ;;  %v1149_v37 = vpop.f32.mrb[3].mxu0 }
 0x2d8   : > { %v1150_v0 = vadd.f32 %v1285_v3, %v1149_v37 }
 0x2d9   : > { %1181 = vst.msk [vmem:[%s384_s8 + $0x18] sm:$0xff] %vm1021_vm1, %v1155_v19 }
 0x2da   : > { %1180 = vst.msk [vmem:[%s384_s8 + $0x10] sm:$0xff] %vm1021_vm1, %v1150_v0 }
 0x2dd   : > { %v1322_v2 = vpop.f32.mrb[2].mxu1 }
 0x2de   : > { %v1175_v49 = vadd.f32 %v1322_v2, %v1285_v3  ;;  %v1169_v23 = vpop.f32.mrb[3].mxu1 }
 0x2df   : > { %v1170_v21 = vadd.f32 %v1285_v3, %v1169_v23 }
 0x2e0   : > { %1185 = vst.msk [vmem:[%s384_s8 + $0x38] sm:$0xff] %vm1021_vm1, %v1175_v49 }
 0x2e1   : > { %1184 = vst.msk [vmem:[%s384_s8 + $0x30] sm:$0xff] %vm1021_vm1, %v1170_v21 }
 0x2e2 PF: > { %p12_p9 = scmp.ge.s32.totalorder %s1494_s22, 4   ;;  %s2136_s18 = smov %s1438_s19 }
 0x2e3   : > { %s2137_s19 = smov %s1503_s25  ;;  %s2138_s20 = smov %s1494_s22 }
 0x2e4   :  { %14 = sbr.rel (!%p12_p9) target bundleno = 2 (0x2), region = 116 }

</bundles_post_ra>
